<compile_context>
chip_gen: v5e
topology: v5e:2x2
jax: 0.10.0
libtpu: 0.0.40
codegen_flags: <defaults>
</compile_context>

<pallas_src>
import jax
import jax.numpy as jnp
from jax.experimental import pallas as pl
from jax.experimental.pallas import tpu as pltpu

# ----------------------------- model config -----------------------------
BERT_CLS_SIZE = 768      # self.bert_cls_size in the module
HIDDEN        = 32       # logical hidden_size of the MLP head (kept small)
N_CLASS       = 2        # n_class
N_FEATURES    = 16       # n_features (used only for the stand-in CLS)

HIDDEN_PAD    = 128      # hidden padded to a full lane width
CLASS_PAD     = 128      # class/output dim padded to a full lane width
NEG_INF_BIAS  = -1e30    # padded class lanes -> exactly 0 mass after softmax

TILE_B        = 128      # rows per grid step (fills MXU M dim / vreg sublanes)
BATCH         = 256      # total rows per call in the demo (2 batch tiles)


# ----------------------------- Pallas kernel -----------------------------
def online_nlp_kernel(xm_ref, proj_ref, w1_ref, w23_ref, b_ref, out_ref):
    """Fused: masked projection + tanh (stand-in CLS) -> 3-layer MLP -> softmax.

    Weights are bf16 (MXU-native); accumulation and elementwise math are f32.
    xm_ref packs [0] = X_hap, [1] = mask; w23_ref packs [w2 | w3] along lanes;
    b_ref packs rows [b1; b2; b3].
    """
    # stand-in CLS embedding (replaces tokenizer + BERT encoder)
    x = xm_ref[0] * xm_ref[1]                                        # [tB, 16] f32
    cls = jnp.dot(x.astype(jnp.bfloat16), proj_ref[...],
                  preferred_element_type=jnp.float32)                # [tB, 768]
    cls = jnp.tanh(cls)

    b1 = b_ref[0:1, :]                                               # [1, 128]
    b2 = b_ref[1:2, :]
    b3 = b_ref[2:3, :]

    # MLP head: Linear -> ReLU -> Linear -> ReLU -> Linear  (lane-padded to 128)
    h1 = jnp.dot(cls.astype(jnp.bfloat16), w1_ref[...],
                 preferred_element_type=jnp.float32) + b1            # [tB, 128]
    h1 = jnp.maximum(h1, 0.0)

    h2 = jnp.dot(h1.astype(jnp.bfloat16), w23_ref[:, :HIDDEN_PAD],
                 preferred_element_type=jnp.float32) + b2            # [tB, 128]
    h2 = jnp.maximum(h2, 0.0)

    logits = jnp.dot(h2.astype(jnp.bfloat16), w23_ref[:, HIDDEN_PAD:],
                     preferred_element_type=jnp.float32) + b3        # [tB, 128]
    # padded class lanes carry a -1e30 bias -> exp() == 0 -> softmax unaffected

    m = jnp.max(logits, axis=-1, keepdims=True)
    e = jnp.exp(logits - m)
    s = jnp.sum(e, axis=-1, keepdims=True)
    out_ref[...] = e / s                       # exact normalization, lane-dense store


def online_nlp_forward(xm, proj, params):
    """Single pallas_call, grid over batch tiles; weights stay VMEM-resident.

    xm: [2, B, N_FEATURES] packed (X_hap, mask).  Returns padded probabilities
    [B, CLASS_PAD]; caller slices [:, :N_CLASS].
    """
    w1, w23, b_all = params
    B = xm.shape[1]
    assert B % TILE_B == 0
    n_tiles = B // TILE_B

    const2d = lambda shape: pl.BlockSpec(shape, lambda i: (0, 0))

    return pl.pallas_call(
        online_nlp_kernel,
        out_shape=jax.ShapeDtypeStruct((B, CLASS_PAD), jnp.float32),
        grid=(n_tiles,),
        in_specs=[
            pl.BlockSpec((2, TILE_B, N_FEATURES), lambda i: (0, i, 0)),  # pipelined
            const2d(proj.shape),    # weights: constant index_map -> fetched once
            const2d(w1.shape),
            const2d(w23.shape),
            const2d(b_all.shape),
        ],
        out_specs=pl.BlockSpec((TILE_B, CLASS_PAD), lambda i: (i, 0)),
        compiler_params=pltpu.CompilerParams(
            dimension_semantics=("parallel",)),   # v7x: split tiles across both TCs
    )(xm, proj, w1, w23, b_all)


# ----------------------------- parameter init -----------------------------
def init_params(key):
    """Synthetic MLP weights (shapes match nn.Sequential in __init__), stored
    as [in, out] (transpose of torch Linear.weight), lane-padded, packed, bf16."""
    k1, k2, k3 = jax.random.split(key, 3)
    s1 = 1.0 / jnp.sqrt(BERT_CLS_SIZE)
    s2 = 1.0 / jnp.sqrt(HIDDEN)
    w1 = jax.random.uniform(k1, (BERT_CLS_SIZE, HIDDEN), jnp.float32, -s1, s1)
    w2 = jax.random.uniform(k2, (HIDDEN, HIDDEN), jnp.float32, -s2, s2)
    w3 = jax.random.uniform(k3, (HIDDEN, N_CLASS), jnp.float32, -s2, s2)

    # zero-pad hidden 32->128 and classes 2->128; weights to bf16 (MXU inputs)
    w1p = jnp.zeros((BERT_CLS_SIZE, HIDDEN_PAD), jnp.float32)
    w1p = w1p.at[:, :HIDDEN].set(w1).astype(jnp.bfloat16)
    w2p = jnp.zeros((HIDDEN_PAD, HIDDEN_PAD), jnp.float32).at[:HIDDEN, :HIDDEN].set(w2)
    w3p = jnp.zeros((HIDDEN_PAD, CLASS_PAD), jnp.float32).at[:HIDDEN, :N_CLASS].set(w3)
    w23p = jnp.concatenate([w2p, w3p], axis=1).astype(jnp.bfloat16)   # [128, 256]

    # biases packed [b1; b2; b3]; padded class lanes get a huge negative bias
    # so softmax assigns them exactly 0 mass (f32 -> exp underflows to 0)
    b_all = jnp.zeros((3, CLASS_PAD), jnp.float32)
    b_all = b_all.at[2, :].set(NEG_INF_BIAS)
    b_all = b_all.at[2, :N_CLASS].set(0.0)
    return (w1p, w23p, b_all)


def make_projection(key):
    """Deterministic stand-in for tokenizer + BERT CLS path (bf16 weights).
    # TODO(synk): tokenizer + pretrained (Distil)BERT encoder have no Pallas
    # equivalent; replaced by a fixed random projection of the masked inputs.
    """
    proj = jax.random.normal(key, (N_FEATURES, BERT_CLS_SIZE), jnp.float32) * 0.02
    return proj.astype(jnp.bfloat16)


# ----------------------------- reference -----------------------------
def reference_forward(X_hap, mask_f, proj, params):
    """Pure-JAX reference using the exact same (bf16-in / f32-acc) arithmetic."""
    w1, w23, b_all = params
    w2 = w23[:, :HIDDEN_PAD]
    w3 = w23[:, HIDDEN_PAD:]
    b1, b2, b3 = b_all[0:1], b_all[1:2], b_all[2:3]

    x = X_hap * mask_f
    cls = jnp.tanh(jnp.dot(x.astype(jnp.bfloat16), proj,
                           preferred_element_type=jnp.float32))
    h1 = jnp.maximum(jnp.dot(cls.astype(jnp.bfloat16), w1,
                             preferred_element_type=jnp.float32) + b1, 0.0)
    h2 = jnp.maximum(jnp.dot(h1.astype(jnp.bfloat16), w2,
                             preferred_element_type=jnp.float32) + b2, 0.0)
    logits = jnp.dot(h2.astype(jnp.bfloat16), w3,
                     preferred_element_type=jnp.float32) + b3
    return jax.nn.softmax(logits, axis=-1)[:, :N_CLASS]


# ----------------------------- main -----------------------------
if __name__ == "__main__":
    key = jax.random.PRNGKey(0)
    k_param, k_proj, k_x, k_m = jax.random.split(key, 4)

    params = init_params(k_param)
    proj = make_projection(k_proj)

    # Batch of haphazard inputs + availability masks (as in the module's forward()),
    # packed into one array so they travel in a single DMA.
    X_hap = jax.random.normal(k_x, (BATCH, N_FEATURES), jnp.float32)
    mask_f = (jax.random.uniform(k_m, (BATCH, N_FEATURES)) > 0.5).astype(jnp.float32)
    xm = jnp.stack([X_hap, mask_f], axis=0)                          # [2, B, 16]

    pred_padded = online_nlp_forward(xm, proj, params)               # [B, 128]
    pred_padded = jax.block_until_ready(pred_padded)
    pred = pred_padded[:, :N_CLASS]                                  # [B, n_class]

    ref = reference_forward(X_hap, mask_f, proj, params)
    assert pred.shape == (BATCH, N_CLASS), pred.shape
    assert jnp.allclose(pred, ref, atol=1e-3, rtol=1e-3), (pred, ref)
    assert jnp.allclose(jnp.sum(pred, axis=-1), 1.0, atol=1e-5)

    # matches `return pred.squeeze(0)` in the module (one request per row)
    pred_squeezed = jnp.squeeze(pred[:1], axis=0)
    _ = jax.block_until_ready(pred_squeezed)

    print("KERNEL_OK")
</pallas_src>

<mosaic_0001>
module attributes {stable_mosaic.version = 11 : i64} {
  func.func @online_nlp_kernel(%arg0: i32, %arg1: memref<2x128x16xf32, #tpu.memory_space<vmem>>, %arg2: memref<16x768xbf16, #tpu.memory_space<vmem>>, %arg3: memref<768x128xbf16, #tpu.memory_space<vmem>>, %arg4: memref<128x256xbf16, #tpu.memory_space<vmem>>, %arg5: memref<3x128xf32, #tpu.memory_space<vmem>>, %arg6: memref<128x128xf32, #tpu.memory_space<vmem>>) attributes {dimension_semantics = [#tpu.dimension_semantics<parallel>], iteration_bounds = array<i64: 2>, scalar_prefetch = 0 : i64, scratch_operands = 0 : i64, tpu.core_type = #tpu.core_type<tc>, window_params = [{transform_indices = @transform_0, window_bounds = array<i64: 2, 128, 16>}, {pipeline_mode = #tpu.pipeline_mode<synchronous>, transform_indices = @transform_1, window_bounds = array<i64: 16, 768>}, {pipeline_mode = #tpu.pipeline_mode<synchronous>, transform_indices = @transform_2, window_bounds = array<i64: 768, 128>}, {pipeline_mode = #tpu.pipeline_mode<synchronous>, transform_indices = @transform_3, window_bounds = array<i64: 128, 256>}, {pipeline_mode = #tpu.pipeline_mode<synchronous>, transform_indices = @transform_4, window_bounds = array<i64: 3, 128>}, {transform_indices = @transform_5, window_bounds = array<i64: 128, 128>}]} {
    %c0 = arith.constant 0 : index
    %c0_0 = arith.constant 0 : index
    %c0_1 = arith.constant 0 : index
    %0 = vector.load %arg1[%c0, %c0_0, %c0_1] : memref<2x128x16xf32, #tpu.memory_space<vmem>>, vector<1x128x16xf32>
    %1 = vector.shape_cast %0 : vector<1x128x16xf32> to vector<128x16xf32>
    %c1 = arith.constant 1 : index
    %c0_2 = arith.constant 0 : index
    %c0_3 = arith.constant 0 : index
    %2 = vector.load %arg1[%c1, %c0_2, %c0_3] : memref<2x128x16xf32, #tpu.memory_space<vmem>>, vector<1x128x16xf32>
    %3 = vector.shape_cast %2 : vector<1x128x16xf32> to vector<128x16xf32>
    %4 = arith.mulf %1, %3 : vector<128x16xf32>
    %5 = arith.truncf %4 : vector<128x16xf32> to vector<128x16xbf16>
    %c0_4 = arith.constant 0 : index
    %c0_5 = arith.constant 0 : index
    %6 = vector.load %arg2[%c0_4, %c0_5] : memref<16x768xbf16, #tpu.memory_space<vmem>>, vector<16x768xbf16>
    %cst = arith.constant dense<0.000000e+00> : vector<128x768xf32>
    %7 = tpu.matmul %5, %6, %cst {dimension_numbers = #tpu.dot_dimension_numbers<[1], [0], [0], [1], [0, 0, 1, 1], [], []>} : vector<128x16xbf16>, vector<16x768xbf16>, vector<128x768xf32> -> vector<128x768xf32>
    %8 = math.tanh %7 : vector<128x768xf32>
    %c0_6 = arith.constant 0 : index
    %c0_7 = arith.constant 0 : index
    %9 = vector.load %arg5[%c0_6, %c0_7] : memref<3x128xf32, #tpu.memory_space<vmem>>, vector<1x128xf32>
    %c1_8 = arith.constant 1 : index
    %c0_9 = arith.constant 0 : index
    %10 = vector.load %arg5[%c1_8, %c0_9] : memref<3x128xf32, #tpu.memory_space<vmem>>, vector<1x128xf32>
    %c2 = arith.constant 2 : index
    %c0_10 = arith.constant 0 : index
    %11 = vector.load %arg5[%c2, %c0_10] : memref<3x128xf32, #tpu.memory_space<vmem>>, vector<1x128xf32>
    %12 = arith.truncf %8 : vector<128x768xf32> to vector<128x768xbf16>
    %c0_11 = arith.constant 0 : index
    %c0_12 = arith.constant 0 : index
    %13 = vector.load %arg3[%c0_11, %c0_12] : memref<768x128xbf16, #tpu.memory_space<vmem>>, vector<768x128xbf16>
    %cst_13 = arith.constant dense<0.000000e+00> : vector<128x128xf32>
    %14 = tpu.matmul %12, %13, %cst_13 {dimension_numbers = #tpu.dot_dimension_numbers<[1], [0], [0], [1], [0, 0, 1, 1], [], []>} : vector<128x768xbf16>, vector<768x128xbf16>, vector<128x128xf32> -> vector<128x128xf32>
    %15 = vector.broadcast %9 : vector<1x128xf32> to vector<128x128xf32>
    %16 = arith.addf %14, %15 : vector<128x128xf32>
    %cst_14 = arith.constant 0.000000e+00 : f32
    %17 = vector.broadcast %cst_14 : f32 to vector<128x128xf32>
    %18 = arith.maximumf %16, %17 : vector<128x128xf32>
    %19 = arith.truncf %18 : vector<128x128xf32> to vector<128x128xbf16>
    %c0_15 = arith.constant 0 : index
    %c0_16 = arith.constant 0 : index
    %20 = vector.load %arg4[%c0_15, %c0_16] : memref<128x256xbf16, #tpu.memory_space<vmem>>, vector<128x128xbf16>
    %cst_17 = arith.constant dense<0.000000e+00> : vector<128x128xf32>
    %21 = tpu.matmul %19, %20, %cst_17 {dimension_numbers = #tpu.dot_dimension_numbers<[1], [0], [0], [1], [0, 0, 1, 1], [], []>} : vector<128x128xbf16>, vector<128x128xbf16>, vector<128x128xf32> -> vector<128x128xf32>
    %22 = vector.broadcast %10 : vector<1x128xf32> to vector<128x128xf32>
    %23 = arith.addf %21, %22 : vector<128x128xf32>
    %cst_18 = arith.constant 0.000000e+00 : f32
    %24 = vector.broadcast %cst_18 : f32 to vector<128x128xf32>
    %25 = arith.maximumf %23, %24 : vector<128x128xf32>
    %26 = arith.truncf %25 : vector<128x128xf32> to vector<128x128xbf16>
    %c0_19 = arith.constant 0 : index
    %c128 = arith.constant 128 : index
    %27 = vector.load %arg4[%c0_19, %c128] : memref<128x256xbf16, #tpu.memory_space<vmem>>, vector<128x128xbf16>
    %cst_20 = arith.constant dense<0.000000e+00> : vector<128x128xf32>
    %28 = tpu.matmul %26, %27, %cst_20 {dimension_numbers = #tpu.dot_dimension_numbers<[1], [0], [0], [1], [0, 0, 1, 1], [], []>} : vector<128x128xbf16>, vector<128x128xbf16>, vector<128x128xf32> -> vector<128x128xf32>
    %29 = vector.broadcast %11 : vector<1x128xf32> to vector<128x128xf32>
    %30 = arith.addf %28, %29 : vector<128x128xf32>
    %cst_21 = arith.constant dense<0xFF800000> : vector<128xf32>
    %31 = vector.multi_reduction <maximumf>, %30, %cst_21 [1] : vector<128x128xf32> to vector<128xf32>
    %32 = vector.shape_cast %31 : vector<128xf32> to vector<128x1xf32>
    %33 = vector.broadcast %32 : vector<128x1xf32> to vector<128x128xf32>
    %34 = arith.subf %30, %33 : vector<128x128xf32>
    %35 = math.exp %34 : vector<128x128xf32>
    %cst_22 = arith.constant dense<0.000000e+00> : vector<128xf32>
    %36 = vector.multi_reduction <add>, %35, %cst_22 [1] : vector<128x128xf32> to vector<128xf32>
    %37 = vector.shape_cast %36 : vector<128xf32> to vector<128x1xf32>
    %38 = vector.broadcast %37 : vector<128x1xf32> to vector<128x128xf32>
    %39 = arith.divf %35, %38 : vector<128x128xf32>
    %c0_23 = arith.constant 0 : index
    %c0_24 = arith.constant 0 : index
    %40 = vector.load %arg6[%c0_23, %c0_24] : memref<128x128xf32, #tpu.memory_space<vmem>>, vector<128x128xf32>
    tpu.vector_store %arg6[%c0_23, %c0_24], %39 {strides = array<i32>} : memref<128x128xf32, #tpu.memory_space<vmem>>, vector<128x128xf32>,
    return
  }
  func.func @transform_0(%arg0: i32) -> (i32, i32, i32) {
    %c0_i32 = arith.constant 0 : i32
    %c0_i32_0 = arith.constant 0 : i32
    %c0_i32_1 = arith.constant 0 : i32
    return %c0_i32, %arg0, %c0_i32_0 : i32, i32, i32
  }
  func.func @transform_1(%arg0: i32) -> (i32, i32) {
    %c0_i32 = arith.constant 0 : i32
    %c0_i32_0 = arith.constant 0 : i32
    %c0_i32_1 = arith.constant 0 : i32
    return %c0_i32, %c0_i32_0 : i32, i32
  }
  func.func @transform_2(%arg0: i32) -> (i32, i32) {
    %c0_i32 = arith.constant 0 : i32
    %c0_i32_0 = arith.constant 0 : i32
    %c0_i32_1 = arith.constant 0 : i32
    return %c0_i32, %c0_i32_0 : i32, i32
  }
  func.func @transform_3(%arg0: i32) -> (i32, i32) {
    %c0_i32 = arith.constant 0 : i32
    %c0_i32_0 = arith.constant 0 : i32
    %c0_i32_1 = arith.constant 0 : i32
    return %c0_i32, %c0_i32_0 : i32, i32
  }
  func.func @transform_4(%arg0: i32) -> (i32, i32) {
    %c0_i32 = arith.constant 0 : i32
    %c0_i32_0 = arith.constant 0 : i32
    %c0_i32_1 = arith.constant 0 : i32
    return %c0_i32, %c0_i32_0 : i32, i32
  }
  func.func @transform_5(%arg0: i32) -> (i32, i32) {
    %c0_i32 = arith.constant 0 : i32
    %c0_i32_0 = arith.constant 0 : i32
    return %arg0, %c0_i32 : i32, i32
  }
}

</mosaic_0001>

<bundles_post_ra>
// kernel: tpu_custom_call.1
= control target key start
LH: loop header
LB: loop body
LE: loop exit
PB: predicated region body
PF: predicated region fallthrough
CT: control target
= control target key end

     0   :  { %10 = vsyncpa [#allocation4], 0  ;;  %s4068_s0 = inlined_call_operand.vmem [shape: f32[2,256,16], index: 0, kind: input, shape index: {}]   ;;  %s4069_s1 = inlined_call_operand.vmem [shape: bf16[16,768], index: 1, kind: input, shape index: {}]   ;;  %s4070_s2 = inlined_call_operand.vmem [shape: bf16[768,128], index: 2, kind: input, shape index: {}]   ;;  %s4071_s3 = inlined_call_operand.vmem [shape: bf16[128,256], index: 3, kind: input, shape index: {}]   ;;  %s4072_s4 = inlined_call_operand.vmem [shape: f32[3,128], index: 4, kind: input, shape index: {}]   ;;  %s4073_s5 = inlined_call_operand.hbm [shape: f32[256,128], index: 5, kind: output, shape index: {}]  }
   0x1   :  { %12 = vsyncpa [#allocation4 + $0x1], 0  ;;  %s3180_s18 = smov 0   ;;  %s3182_s19 = smov 0  }
   0x2   :  { %s3184_s20 = smov 0   ;;  %s3186_s21 = smov 0  }
   0x3 LB: > { %s2351_s22 = sadd.s32 4294967295, %s3146_s21   ;;  %s2352_s23 = sadd.s32 4294967294, %s3146_s21   ;;  %s3146_s21 = sphi %s3186_s21, %s4079_s21   ;;  %s3142_s20 = sphi %s3184_s20, %s4078_s20   ;;  %s3138_s19 = sphi %s3182_s19, %s4077_s19   ;;  %s3134_s18 = sphi %s3180_s18, %s4076_s18  }
   0x4   : > { %s3203_s24 = sadd.s32 1, %s3146_s21   ;;  %s25_s25 = sadd.s32 1, %s3142_s20 }
   0x5   : > { %s22_s26 = ssub.s32 %s3146_s21, %s3203_s24  ;;  %p32_p0 = scmp.ne.s32.totalorder %s3142_s20, %s3138_s19 }
   0x6   : > { %p23_p1 = scmp.eq.s32.totalorder %s22_s26, 0  ;;  %p33_p2 = scmp.eq.s32.totalorder %s3146_s21, 0 }
   0x7   : > { %p146_p3 = scmp.eq.s32.totalorder %s2351_s22, 1  ;;  %p151_p4 = scmp.ne.s32.totalorder %s3138_s19, %s3134_s18 }
   0x8   : > { %s3216_s27 = scalar_select %p23_p1, %s3142_s20, %s25_s25  }
   0x9   : > { %p34_p5 = por %p33_p2, %p32_p0  ;;  %p3218_p6 = por %p146_p3, %p32_p0 }
   0xa   : > { %p152_p7 = scmp.eq.s32.totalorder %s2352_s23, 1  ;;  %p2354_p9 = scmp.ge.s32.totalorder %s3146_s21, 2 }
   0xc   : > { %p3222_p8 = por %p152_p7, %p151_p4  ;;  %180 = sbr.rel (%p2354_p9) target bundleno = 53 (0x35), region = 32 }
  0x11   : > { %183 = sbr.rel (!%p34_p5) target bundleno = 53 (0x35), region = 36  ;;  %s185_s30 = sand.u32 (%p34_p5), 1, %s3142_s20  }
  0x12   : > { %s2710_s6 = sshll.u32 (%p34_p5), %s3146_s21, 7  ;;  %s2355_s7 = sshll.u32 (%p34_p5), %s185_s30, 8 }
  0x13   : > { %s3234_s10 = scalar_lea.vmem (%p34_p5), %s4068_s0, %s2710_s6  ;;  %s3239_s11 = scalar_lea.vmem (%p34_p5), [#allocation2], %s2355_s7 }
  0x14   : > { %v281_v0 = vld [vmem:[%s3234_s10] sm:$0xff] (%p34_p5)  ;;  %v283_v1 = vld [vmem:[%s3234_s10 + $0x8] sm:$0xff] (%p34_p5)  ;;  %v285_v2 = vld [vmem:[%s3234_s10 + $0x10] sm:$0xff] (%p34_p5) }
  0x15   : > { %282 = vst [vmem:[%s3239_s11] sm:$0xff] (%p34_p5), %v281_v0  ;;  %v287_v3 = vld [vmem:[%s3234_s10 + $0x18] sm:$0xff] (%p34_p5)  ;;  %v289_v4 = vld [vmem:[%s3234_s10 + $0x20] sm:$0xff] (%p34_p5)  ;;  %v291_v5 = vld [vmem:[%s3234_s10 + $0x28] sm:$0xff] (%p34_p5) }
  0x16   : > { %284 = vst [vmem:[%s3239_s11 + $0x8] sm:$0xff] %v283_v1  ;;  %v293_v6 = vld [vmem:[%s3234_s10 + $0x30] sm:$0xff]  ;;  %v295_v7 = vld [vmem:[%s3234_s10 + $0x38] sm:$0xff]  ;;  %v297_v8 = vld [vmem:[%s3234_s10 + $0x40] sm:$0xff] }
  0x17   : > { %286 = vst [vmem:[%s3239_s11 + $0x10] sm:$0xff] %v285_v2  ;;  %v299_v9 = vld [vmem:[%s3234_s10 + $0x48] sm:$0xff]  ;;  %v301_v10 = vld [vmem:[%s3234_s10 + $0x50] sm:$0xff]  ;;  %v303_v11 = vld [vmem:[%s3234_s10 + $0x58] sm:$0xff] }
  0x18   : > { %288 = vst [vmem:[%s3239_s11 + $0x18] sm:$0xff] %v287_v3  ;;  %v305_v12 = vld [vmem:[%s3234_s10 + $0x60] sm:$0xff]  ;;  %v307_v13 = vld [vmem:[%s3234_s10 + $0x68] sm:$0xff]  ;;  %v309_v14 = vld [vmem:[%s3234_s10 + $0x70] sm:$0xff] }
  0x19   : > { %290 = vst [vmem:[%s3239_s11 + $0x20] sm:$0xff] %v289_v4  ;;  %v311_v15 = vld [vmem:[%s3234_s10 + $0x78] sm:$0xff]  ;;  %v313_v16 = vld [vmem:[%s3234_s10 + $0x100] sm:$0xff]  ;;  %v315_v17 = vld [vmem:[%s3234_s10 + $0x108] sm:$0xff] }
  0x1a   : > { %292 = vst [vmem:[%s3239_s11 + $0x28] sm:$0xff] %v291_v5  ;;  %v317_v18 = vld [vmem:[%s3234_s10 + $0x110] sm:$0xff]  ;;  %v319_v19 = vld [vmem:[%s3234_s10 + $0x118] sm:$0xff]  ;;  %v321_v20 = vld [vmem:[%s3234_s10 + $0x120] sm:$0xff] }
  0x1b   : > { %294 = vst [vmem:[%s3239_s11 + $0x30] sm:$0xff] %v293_v6  ;;  %v323_v21 = vld [vmem:[%s3234_s10 + $0x128] sm:$0xff]  ;;  %v325_v22 = vld [vmem:[%s3234_s10 + $0x130] sm:$0xff]  ;;  %v327_v23 = vld [vmem:[%s3234_s10 + $0x138] sm:$0xff] }
  0x1c   : > { %296 = vst [vmem:[%s3239_s11 + $0x38] sm:$0xff] %v295_v7  ;;  %v329_v24 = vld [vmem:[%s3234_s10 + $0x140] sm:$0xff]  ;;  %v331_v25 = vld [vmem:[%s3234_s10 + $0x148] sm:$0xff]  ;;  %v333_v26 = vld [vmem:[%s3234_s10 + $0x150] sm:$0xff] }
  0x1d   : > { %298 = vst [vmem:[%s3239_s11 + $0x40] sm:$0xff] %v297_v8  ;;  %v335_v27 = vld [vmem:[%s3234_s10 + $0x158] sm:$0xff]  ;;  %v337_v28 = vld [vmem:[%s3234_s10 + $0x160] sm:$0xff]  ;;  %v339_v29 = vld [vmem:[%s3234_s10 + $0x168] sm:$0xff] }
  0x1e   : > { %300 = vst [vmem:[%s3239_s11 + $0x48] sm:$0xff] %v299_v9  ;;  %v341_v30 = vld [vmem:[%s3234_s10 + $0x170] sm:$0xff]  ;;  %v343_v31 = vld [vmem:[%s3234_s10 + $0x178] sm:$0xff] }
  0x1f   : > { %302 = vst [vmem:[%s3239_s11 + $0x50] sm:$0xff] %v301_v10 }
  0x20   : > { %304 = vst [vmem:[%s3239_s11 + $0x58] sm:$0xff] %v303_v11 }
  0x21   : > { %306 = vst [vmem:[%s3239_s11 + $0x60] sm:$0xff] %v305_v12 }
  0x22   : > { %308 = vst [vmem:[%s3239_s11 + $0x68] sm:$0xff] %v307_v13 }
  0x23   : > { %310 = vst [vmem:[%s3239_s11 + $0x70] sm:$0xff] %v309_v14 }
  0x24   : > { %312 = vst [vmem:[%s3239_s11 + $0x78] sm:$0xff] %v311_v15 }
  0x25   : > { %314 = vst [vmem:[%s3239_s11 + $0x80] sm:$0xff] %v313_v16 }
  0x26   : > { %316 = vst [vmem:[%s3239_s11 + $0x88] sm:$0xff] %v315_v17 }
  0x27   : > { %318 = vst [vmem:[%s3239_s11 + $0x90] sm:$0xff] %v317_v18 }
  0x28   : > { %320 = vst [vmem:[%s3239_s11 + $0x98] sm:$0xff] %v319_v19 }
  0x29   : > { %322 = vst [vmem:[%s3239_s11 + $0xa0] sm:$0xff] %v321_v20 }
  0x2a   : > { %324 = vst [vmem:[%s3239_s11 + $0xa8] sm:$0xff] %v323_v21 }
  0x2b   : > { %326 = vst [vmem:[%s3239_s11 + $0xb0] sm:$0xff] %v325_v22 }
  0x2c   : > { %328 = vst [vmem:[%s3239_s11 + $0xb8] sm:$0xff] %v327_v23 }
  0x2d   : > { %330 = vst [vmem:[%s3239_s11 + $0xc0] sm:$0xff] %v329_v24 }
  0x2e   : > { %332 = vst [vmem:[%s3239_s11 + $0xc8] sm:$0xff] %v331_v25 }
  0x2f   : > { %334 = vst [vmem:[%s3239_s11 + $0xd0] sm:$0xff] %v333_v26 }
  0x30   : > { %336 = vst [vmem:[%s3239_s11 + $0xd8] sm:$0xff] %v335_v27 }
  0x31   : > { %338 = vst [vmem:[%s3239_s11 + $0xe0] sm:$0xff] %v337_v28 }
  0x32   : > { %340 = vst [vmem:[%s3239_s11 + $0xe8] sm:$0xff] %v339_v29 }
  0x33   : > { %342 = vst [vmem:[%s3239_s11 + $0xf0] sm:$0xff] %v341_v30 }
  0x34   : > { %344 = vst [vmem:[%s3239_s11 + $0xf8] sm:$0xff] %v343_v31 }
  0x35 PF: > { %p2358_p10 = scmp.ge.s32.totalorder %s3146_s21, 1  ;;  %p349_p11 = scmp.lt.s32.totalorder %s3146_s21, 3 }
  0x37   : > { %p350_p12 = pnand %p2358_p10, %p349_p11 }
  0x38   : > { %s3317_s26 = sand.u32 (!%p350_p12), 1, %s3138_s19   ;;  %s2781_s11 = sshll.u32 (!%p350_p12), %s2351_s22, 7 }
  0x39   : > { %353 = sbr.rel (%p350_p12) target bundleno = 1193 (0x4a9), region = 74  ;;  %s2359_s7 = sshll.u32 (!%p350_p12), %s3317_s26, 8 }
  0x3a   : > { %s3332_s14 = scalar_lea.vmem (!%p350_p12), [#allocation2], %s2359_s7  ;;  %s2360_s9 = sshll.u32 (!%p350_p12), %s3317_s26, 7 }
  0x3b   : > { %s3997_s10 = scalar_lea.vmem (!%p350_p12), [#allocation3], %s2360_s9  ;;  %s2269_s16 = scalar_lea.sflag (!%p350_p12), [#allocation4], %s3317_s26 }
  0x3c   : > { %s2281_s15 = sshll.u32 (!%p350_p12), %s3997_s10, 4  ;;  %s3104_s6 = scalar_lea.hbm (!%p350_p12), %s4073_s5, 256  ;;  %s2282_s15 = int_to_ptr.vmem [resolvable:$true] %s2281_s15 }
  0x3e   : > { %v2379_v32 = vld [vmem:[%s4069_s1] sm:$0xf]  ;;  %v2714_v33 = vld [vmem:[%s4069_s1 + $0x14] sm:$0xf0]  ;;  %v2711_v34 = vld [vmem:[%s4069_s1 + $0x4] sm:$0xf] }
  0x3f   : > { %v2380_v35 = vor.u32 %v2714_v33, %v2379_v32  ;;  %v2381_v36 = vld [vmem:[%s4069_s1 + $0x18] sm:$0xf0]  ;;  %v2387_v37 = vld [vmem:[%s4069_s1 + $0x8] sm:$0xf]  ;;  %v2715_v39 = vld [vmem:[%s4069_s1 + $0x1c] sm:$0xf0] }
  0x40   : > { %v2384_v38 = vor.u32 %v2711_v34, %v2381_v36  ;;  %v2712_v40 = vld [vmem:[%s4069_s1 + $0xc] sm:$0xf]  ;;  %v2388_v41 = vor.u32 %v2715_v39, %v2387_v37  ;;  %v2389_v42 = vld [vmem:[%s4069_s1 + $0x20] sm:$0xf0]  ;;  %vm479_vm0 = vcmask 130048   ;;  %v396_v58 = vld [vmem:[%s3332_s14 + $0x50] sm:$0xff] }
  0x41   : > { %2782 = vmatpush.bf16.msra.mxu2 %v2380_v35  ;;  %511 = vmatpush.bf16.msra.mxu0 %v2380_v35  ;;  %v394_v43 = vld [vmem:[%s3332_s14 + $0x40] sm:$0xff]  ;;  %v395_v44 = vld [vmem:[%s3332_s14 + $0x48] sm:$0xff]  ;;  %v2392_v46 = vor.u32 %v2712_v40, %v2389_v42  ;;  %v397_v59 = vld [vmem:[%s3332_s14 + $0x58] sm:$0xff] }
  0x42   : > { %2783 = vmatpush.bf16.msra.mxu3 %v2384_v38  ;;  %v2369_v45 = vld [vmem:[%s3332_s14 + $0xc0] sm:$0xff]  ;;  %560 = vmatpush.bf16.msra.mxu1 %v2384_v38  ;;  %v2370_v47 = vld [vmem:[%s3332_s14 + $0xc8] sm:$0xff]  ;;  %v2371_v60 = vld [vmem:[%s3332_s14 + $0xd0] sm:$0xff] }
  0x43   : > { %v427_v48 = vmul.f32 %v2369_v45, %v394_v43  ;;  %v428_v49 = vmul.f32 %v2370_v47, %v395_v44  ;;  %v386_v50 = vld [vmem:[%s3332_s14] sm:$0xff]  ;;  %v387_v51 = vld [vmem:[%s3332_s14 + $0x8] sm:$0xff]  ;;  %v2372_v61 = vld [vmem:[%s3332_s14 + $0xd8] sm:$0xff]  ;;  %v429_v2 = vmul.f32 %v2371_v60, %v396_v58 }
  0x44   : > { %v2361_v52 = vld [vmem:[%s3332_s14 + $0x80] sm:$0xff]  ;;  %v2362_v53 = vld [vmem:[%s3332_s14 + $0x88] sm:$0xff]  ;;  %v388_v62 = vld [vmem:[%s3332_s14 + $0x10] sm:$0xff]  ;;  %v430_v3 = vmul.f32 %v2372_v61, %v397_v59 }
  0x45   : > { %609 = vmatpush.bf16.msrb.mxu2 %v2388_v41  ;;  %v3342_v54 = vpack.c.bf16 %v428_v49, %v427_v48  ;;  %v419_v55 = vmul.f32 %v2361_v52, %v386_v50  ;;  %v420_v56 = vmul.f32 %v2362_v53, %v387_v51  ;;  %v389_v63 = vld [vmem:[%s3332_s14 + $0x18] sm:$0xff]  ;;  %v2363_v0 = vld [vmem:[%s3332_s14 + $0x90] sm:$0xff]  ;;  %v398_v8 = vld [vmem:[%s3332_s14 + $0x60] sm:$0xff] }
  0x46   : > { %658 = vmatpush.bf16.msrb.mxu3 %v2392_v46  ;;  %v2364_v1 = vld [vmem:[%s3332_s14 + $0x98] sm:$0xff]  ;;  %v421_v4 = vmul.f32 %v2363_v0, %v388_v62  ;;  %v3362_v6 = vpack.c.bf16 %v430_v3, %v429_v2  ;;  %v399_v9 = vld [vmem:[%s3332_s14 + $0x68] sm:$0xff]  ;;  %v2373_v10 = vld [vmem:[%s3332_s14 + $0xe0] sm:$0xff] }
  0x47   : > { %2405 = vmatmul.msk.bf16.vlgmr.msra.gmra.mxu2 %vm479_vm0, %v3342_v54  ;;  %2413 = vmatmul.msk.bf16.vlgmr.msra.gmra.mxu3 %vm479_vm0, %v3342_v54  ;;  %v3348_v57 = vpack.c.bf16 %v420_v56, %v419_v55  ;;  %v422_v5 = vmul.f32 %v2364_v1, %v389_v63  ;;  %v2374_v11 = vld [vmem:[%s3332_s14 + $0xe8] sm:$0xff]  ;;  %v390_v12 = vld [vmem:[%s3332_s14 + $0x20] sm:$0xff]  ;;  %v431_v16 = vmul.f32 %v2373_v10, %v398_v8  ;;  %v2724_v22 = vld [vmem:[%s4070_s2 + $0x38] sm:$0xff] }
  0x48   : > { %v391_v13 = vld [vmem:[%s3332_s14 + $0x28] sm:$0xff]  ;;  %v2365_v14 = vld [vmem:[%s3332_s14 + $0xa0] sm:$0xff]  ;;  %v432_v17 = vmul.f32 %v2374_v11, %v399_v9  ;;  %v2732_v23 = vld [vmem:[%s4070_s2 + $0x78] sm:$0xff] }
  0x49   : > { %2401 = vmatmul.msk.bf16.vlgmr.msra.gmra.mxu0 %vm479_vm0, %v3348_v57  ;;  %2409 = vmatmul.msk.bf16.vlgmr.msra.gmra.mxu1 %vm479_vm0, %v3348_v57  ;;  %v3364_v7 = vpack.c.bf16 %v422_v5, %v421_v4  ;;  %v2366_v15 = vld [vmem:[%s3332_s14 + $0xa8] sm:$0xff]  ;;  %v423_v18 = vmul.f32 %v2365_v14, %v390_v12  ;;  %v400_v24 = vld [vmem:[%s3332_s14 + $0x70] sm:$0xff]  ;;  %v401_v25 = vld [vmem:[%s3332_s14 + $0x78] sm:$0xff] }
  0x4a   : > { %v424_v19 = vmul.f32 %v2366_v15, %v391_v13  ;;  %v3382_v20 = vpack.c.bf16 %v432_v17, %v431_v16  ;;  %1330 = vmatpush.bf16.msra.mxu2 %v2724_v22  ;;  %1379 = vmatpush.bf16.msra.mxu3 %v2732_v23  ;;  %v2375_v26 = vld [vmem:[%s3332_s14 + $0xf0] sm:$0xff]  ;;  %v2376_v27 = vld [vmem:[%s3332_s14 + $0xf8] sm:$0xff]  ;;  %v2716_v39 = vld [vmem:[%s4069_s1 + $0x24] sm:$0xf0] }
  0x4b   : > { %v392_v28 = vld [vmem:[%s3332_s14 + $0x30] sm:$0xff]  ;;  %v393_v29 = vld [vmem:[%s3332_s14 + $0x38] sm:$0xff]  ;;  %v433_v32 = vmul.f32 %v2375_v26, %v400_v24  ;;  %v434_v33 = vmul.f32 %v2376_v27, %v401_v25  ;;  %v2397_v43 = vld [vmem:[%s4069_s1 + $0x28] sm:$0xf0] }
  0x4c   : > { %v437_v21 = vpack.c.bf16 %v424_v19, %v423_v18  ;;  %v2367_v30 = vld [vmem:[%s3332_s14 + $0xb0] sm:$0xff]  ;;  %v2368_v31 = vld [vmem:[%s3332_s14 + $0xb8] sm:$0xff]  ;;  %v2722_v46 = vld [vmem:[%s4070_s2 + $0x28] sm:$0xff]  ;;  %s2280_s14 = scalar_lea.hbm %s4073_s5, %s2781_s11 }
  0x4d   : > { %v425_v34 = vmul.f32 %v2367_v30, %v392_v28  ;;  %v426_v35 = vmul.f32 %v2368_v31, %v393_v29  ;;  %v3404_v36 = vpack.c.bf16 %v434_v33, %v433_v32  ;;  %v2395_v38 = vld [vmem:[%s4069_s1 + $0x10] sm:$0xf]  ;;  %v2713_v40 = vld [vmem:[%s4069_s1 + $0x14] sm:$0xf]  ;;  %v2730_v47 = vld [vmem:[%s4070_s2 + $0x68] sm:$0xff]  ;;  %s4034_s22 = sshll.u32 %s2280_s14, 4  ;;  %s2284_s22 = int_to_ptr.hbm [resolvable:$true] %s4034_s22 }
  0x4e   : > { %v2723_v41 = vld [vmem:[%s4070_s2 + $0x30] sm:$0xff]  ;;  %v2396_v42 = vor.u32 %v2716_v39, %v2395_v38  ;;  %v2400_v45 = vor.u32 %v2713_v40, %v2397_v43  ;;  %v2721_v48 = vld [vmem:[%s4070_s2 + $0x20] sm:$0xff]  ;;  %v2720_v50 = vld [vmem:[%s4070_s2 + $0x18] sm:$0xff]  ;;  %s3098_s17 = sshra.s32 %s2284_s22, 4  ;;  %s3099_s17 = int_to_ptr.hbm [resolvable:$true] %s3098_s17 }
  0x4f   : > { %v438_v37 = vpack.c.bf16 %v426_v35, %v425_v34  ;;  %v2731_v44 = vld [vmem:[%s4070_s2 + $0x70] sm:$0xff]  ;;  %1331 = vmatpush.bf16.msra.mxu2 %v2723_v41  ;;  %v2729_v49 = vld [vmem:[%s4070_s2 + $0x60] sm:$0xff]  ;;  %v2728_v51 = vld [vmem:[%s4070_s2 + $0x58] sm:$0xff]  ;;  %s3100_s23 = scalar_lea.hbm %s3099_s17, 128  ;;  %p3105_p2 = scmp.lt.s32.totalorder %s3099_s17, %s4073_s5 }
  0x50   : > { %707 = vmatpush.bf16.msrb.mxu0 %v2396_v42  ;;  %756 = vmatpush.bf16.msrb.mxu1 %v2400_v45  ;;  %v2719_v52 = vld [vmem:[%s4070_s2 + $0x10] sm:$0xff]  ;;  %v2718_v55 = vld [vmem:[%s4070_s2 + $0x8] sm:$0xff]  ;;  %v2725_v62 = vld [vmem:[%s4070_s2 + $0x40] sm:$0xff]  ;;  %p3101_p13 = scmp.ne.s32.totalorder %s3099_s17, %s3100_s23  ;;  %p3106_p3 = scmp.lt.s32.totalorder %s3104_s6, %s3100_s23 }
  0x51   : > { %1380 = vmatpush.bf16.msra.mxu3 %v2731_v44  ;;  %v2727_v53 = vld [vmem:[%s4070_s2 + $0x50] sm:$0xff]  ;;  %v2726_v56 = vld [vmem:[%s4070_s2 + $0x48] sm:$0xff]  ;;  %v2756_v17 = vld [vmem:[%s4070_s2 + $0x138] sm:$0xff] }
  0x52   : > { %v2739_v8 = vld [vmem:[%s4070_s2 + $0xb0] sm:$0xff]  ;;  %v2738_v13 = vld [vmem:[%s4070_s2 + $0xa8] sm:$0xff]  ;;  %v2737_v18 = vld [vmem:[%s4070_s2 + $0xa0] sm:$0xff]  ;;  %p3102_p0 = pnand %p3101_p13, %p3218_p6  ;;  %p3107_p4 = por %p3106_p3, %p3105_p2 }
  0x53   : > { %1332 = vmatpush.bf16.msra.mxu2 %v2722_v46  ;;  %v2747_v9 = vld [vmem:[%s4070_s2 + $0xf0] sm:$0xff]  ;;  %v2746_v14 = vld [vmem:[%s4070_s2 + $0xe8] sm:$0xff]  ;;  %v2745_v19 = vld [vmem:[%s4070_s2 + $0xe0] sm:$0xff] }
  0x54   : > { %v2764_v22 = vld [vmem:[%s4070_s2 + $0x178] sm:$0xff]  ;;  %v2735_v31 = vld [vmem:[%s4070_s2 + $0x90] sm:$0xff]  ;;  %v2742_v38 = vld [vmem:[%s4070_s2 + $0xc8] sm:$0xff]  ;;  %p3103_p1 = pneg %p3102_p0 }
  0x55   : > { %1381 = vmatpush.bf16.msra.mxu3 %v2730_v47  ;;  %v2736_v29 = vld [vmem:[%s4070_s2 + $0x98] sm:$0xff]  ;;  %v2743_v33 = vld [vmem:[%s4070_s2 + $0xd0] sm:$0xff]  ;;  %v2733_v42 = vld [vmem:[%s4070_s2 + $0x80] sm:$0xff] }
  0x56   : > { %v2741_v43 = vld [vmem:[%s4070_s2 + $0xc0] sm:$0xff]  ;;  %p3108_p5 = pnand %p3107_p4, %p3103_p1 }
  0x57   : > { %2406 = vmatmul.msk.bf16.gmra.mxu2 %vm479_vm0, %v3362_v6  ;;  %2414 = vmatmul.msk.bf16.gmra.mxu3 %vm479_vm0, %v3362_v6 }
  0x58   : > { %1333 = vmatpush.bf16.msra.mxu2 %v2721_v48 }
  0x59   : > { %2402 = vmatmul.msk.bf16.gmra.mxu0 %vm479_vm0, %v3364_v7  ;;  %2410 = vmatmul.msk.bf16.gmra.mxu1 %vm479_vm0, %v3364_v7 }
  0x5a   : > { %1382 = vmatpush.bf16.msra.mxu3 %v2729_v49 }
  0x5c   : > { %1334 = vmatpush.bf16.msra.mxu2 %v2720_v50  ;;  %v2755_v50 = vld [vmem:[%s4070_s2 + $0x130] sm:$0xff] }
  0x5e   : > { %1383 = vmatpush.bf16.msra.mxu3 %v2728_v51  ;;  %v2763_v51 = vld [vmem:[%s4070_s2 + $0x170] sm:$0xff] }
  0x60   : > { %1335 = vmatpush.bf16.msra.mxu2 %v2719_v52 }
  0x62   : > { %1384 = vmatpush.bf16.msra.mxu3 %v2727_v53 }
  0x64   : > { %1336 = vmatpush.bf16.msra.mxu2 %v2718_v55 }
  0x66   : > { %1385 = vmatpush.bf16.msra.mxu3 %v2726_v56 }
  0x67   : > { %2407 = vmatmul.msk.bf16.gmra.mxu2 %vm479_vm0, %v3382_v20  ;;  %2415 = vmatmul.msk.bf16.gmra.mxu3 %vm479_vm0, %v3382_v20 }
  0x69   : > { %2403 = vmatmul.msk.bf16.gmra.mxu0 %vm479_vm0, %v437_v21  ;;  %2411 = vmatmul.msk.bf16.gmra.mxu1 %vm479_vm0, %v437_v21 }
  0x6a   : > { %1386 = vmatpush.bf16.msra.mxu3 %v2725_v62 }
  0x77   : > { %2408 = vmatmul.msk.bf16.gmra.mxu2 %vm479_vm0, %v3404_v36  ;;  %2416 = vmatmul.msk.bf16.gmra.mxu3 %vm479_vm0, %v3404_v36 }
  0x79   : > { %2404 = vmatmul.msk.bf16.gmra.mxu0 %vm479_vm0, %v438_v37  ;;  %2412 = vmatmul.msk.bf16.gmra.mxu1 %vm479_vm0, %v438_v37 }
  0x87   : > { %2417 = vmatmul.msk.bf16.vlgmr.msrb.gmra.mxu2 %vm479_vm0, %v3348_v57  ;;  %2425 = vmatmul.msk.bf16.vlgmr.msrb.gmra.mxu3 %vm479_vm0, %v3348_v57 }
  0x88   : > { %1575 = vmatpush.bf16.msrb.mxu3 %v2764_v22 }
  0x89   : > { %2433 = vmatmul.msk.bf16.vlgmr.msrb.gmra.mxu0 %vm479_vm0, %v3348_v57  ;;  %2441 = vmatmul.msk.bf16.vlgmr.msrb.gmra.mxu1 %vm479_vm0, %v3348_v57 }
  0x8c   : > { %1576 = vmatpush.bf16.msrb.mxu3 %v2763_v51 }
  0x97   : > { %2418 = vmatmul.msk.bf16.gmra.mxu2 %vm479_vm0, %v3364_v7  ;;  %2426 = vmatmul.msk.bf16.gmra.mxu3 %vm479_vm0, %v3364_v7 }
  0x99   : > { %2434 = vmatmul.msk.bf16.gmra.mxu0 %vm479_vm0, %v3364_v7  ;;  %2442 = vmatmul.msk.bf16.gmra.mxu1 %vm479_vm0, %v3364_v7  ;;  %v2740_v7 = vld [vmem:[%s4070_s2 + $0xb8] sm:$0xff] }
  0x9a   : > { %1428 = vmatpush.bf16.msra.mxu0 %v2740_v7  ;;  %v2762_v7 = vld [vmem:[%s4070_s2 + $0x168] sm:$0xff] }
  0x9b   : > { %1577 = vmatpush.bf16.msrb.mxu3 %v2762_v7 }
  0x9e   : > { %1429 = vmatpush.bf16.msra.mxu0 %v2739_v8 }
  0xa2   : > { %1430 = vmatpush.bf16.msra.mxu0 %v2738_v13 }
  0xa6   : > { %1431 = vmatpush.bf16.msra.mxu0 %v2737_v18 }
  0xa7   : > { %2419 = vmatmul.msk.bf16.gmra.mxu2 %vm479_vm0, %v437_v21  ;;  %2427 = vmatmul.msk.bf16.gmra.mxu3 %vm479_vm0, %v437_v21 }
  0xa9   : > { %2435 = vmatmul.msk.bf16.gmra.mxu0 %vm479_vm0, %v437_v21  ;;  %2443 = vmatmul.msk.bf16.gmra.mxu1 %vm479_vm0, %v437_v21 }
  0xaa   : > { %1432 = vmatpush.bf16.msra.mxu0 %v2736_v29 }
  0xae   : > { %1433 = vmatpush.bf16.msra.mxu0 %v2735_v31 }
  0xb7   : > { %2420 = vmatmul.msk.bf16.gmra.mxu2 %vm479_vm0, %v438_v37  ;;  %2428 = vmatmul.msk.bf16.gmra.mxu3 %vm479_vm0, %v438_v37 }
  0xb9   : > { %2436 = vmatmul.msk.bf16.gmra.mxu0 %vm479_vm0, %v438_v37  ;;  %2444 = vmatmul.msk.bf16.gmra.mxu1 %vm479_vm0, %v438_v37  ;;  %v2734_v37 = vld [vmem:[%s4070_s2 + $0x88] sm:$0xff] }
  0xba   : > { %1434 = vmatpush.bf16.msra.mxu0 %v2734_v37 }
  0xbe   : > { %1435 = vmatpush.bf16.msra.mxu0 %v2733_v42 }
  0xc6   : > { %v513_v12 = vpop.f32.mrf.mxu0  ;;  %v562_v15 = vpop.f32.mrf.mxu1 }
  0xc7   : > { %2421 = vmatmul.msk.bf16.gmra.mxu2 %vm479_vm0, %v3342_v54  ;;  %2429 = vmatmul.msk.bf16.gmra.mxu3 %vm479_vm0, %v3342_v54 }
  0xc9   : > { %2437 = vmatmul.msk.bf16.gmra.mxu0 %vm479_vm0, %v3342_v54  ;;  %2445 = vmatmul.msk.bf16.gmra.mxu1 %vm479_vm0, %v3342_v54  ;;  %v2717_v54 = vld [vmem:[%s4070_s2] sm:$0xff] }
  0xca   : > { %v533_v57 = vpop.f32.mrf.mxu2  ;;  %v582_v58 = vpop.f32.mrf.mxu3  ;;  %1337 = vmatpush.bf16.msra.mxu2 %v2717_v54 }
  0xcb   : > { %2828 = vtanh.f32 %v533_v57 }
  0xcc   : > { %2830 = vtanh.f32 %v582_v58 }
  0xce   : > { %1526 = vmatpush.bf16.msrb.mxu2 %v2756_v17  ;;  %v515_v30 = vpop.f32.mrf.mxu0  ;;  %v564_v32 = vpop.f32.mrf.mxu1 }
  0xd1   : > { %v3492_v61 = vpop.eup %2828 }
  0xd2   : > { %v535_v59 = vpop.f32.mrf.mxu2  ;;  %v584_v60 = vpop.f32.mrf.mxu3  ;;  %1527 = vmatpush.bf16.msrb.mxu2 %v2755_v50 }
  0xd3   : > { %2832 = vtanh.f32 %v535_v59  ;;  %v3504_v63 = vpop.eup %2830 }
  0xd4   : > { %2834 = vtanh.f32 %v584_v60 }
  0xd6   : > { %v518_v40 = vpop.f32.mrf.mxu0  ;;  %v567_v45 = vpop.f32.mrf.mxu1 }
  0xd7   : > { %2422 = vmatmul.msk.bf16.gmra.mxu2 %vm479_vm0, %v3362_v6  ;;  %2430 = vmatmul.msk.bf16.gmra.mxu3 %vm479_vm0, %v3362_v6 }
  0xd9   : > { %v3506_v0 = vpop.eup %2832  ;;  %2438 = vmatmul.msk.bf16.gmra.mxu0 %vm479_vm0, %v3362_v6  ;;  %2446 = vmatmul.msk.bf16.gmra.mxu1 %vm479_vm0, %v3362_v6  ;;  %v2748_v6 = vld [vmem:[%s4070_s2 + $0xf8] sm:$0xff] }
  0xda   : > { %v3512_v1 = vpop.eup %2834  ;;  %v538_v2 = vpop.f32.mrf.mxu2  ;;  %v921_v4 = vpack.c.bf16 %v3506_v0, %v3492_v61  ;;  %1477 = vmatpush.bf16.msra.mxu1 %v2748_v6 }
  0xdb   : > { %v587_v3 = vpop.f32.mrf.mxu3  ;;  %v922_v5 = vpack.c.bf16 %v3512_v1, %v3504_v63  ;;  %2836 = vtanh.f32 %v538_v2 }
  0xdc   : > { %2838 = vtanh.f32 %v587_v3  ;;  %v2754_v3 = vld [vmem:[%s4070_s2 + $0x128] sm:$0xff] }
  0xdd   : > { %1528 = vmatpush.bf16.msrb.mxu2 %v2754_v3 }
  0xde   : > { %1478 = vmatpush.bf16.msra.mxu1 %v2747_v9  ;;  %v520_v56 = vpop.f32.mrf.mxu0  ;;  %v569_v60 = vpop.f32.mrf.mxu1 }
  0xe1   : > { %v3536_v16 = vpop.eup %2836 }
  0xe2   : > { %v540_v10 = vpop.f32.mrf.mxu2  ;;  %1479 = vmatpush.bf16.msra.mxu1 %v2746_v14  ;;  %v3551_v21 = vpop.eup %2838 }
  0xe3   : > { %v589_v11 = vpop.f32.mrf.mxu3  ;;  %2840 = vtanh.f32 %v540_v10 }
  0xe4   : > { %2842 = vtanh.f32 %v589_v11 }
  0xe6   : > { %1480 = vmatpush.bf16.msra.mxu1 %v2745_v19  ;;  %v523_v13 = vpop.f32.mrf.mxu0 }
  0xe7   : > { %2423 = vmatmul.msk.bf16.gmra.mxu2 %vm479_vm0, %v3382_v20  ;;  %2431 = vmatmul.msk.bf16.gmra.mxu3 %vm479_vm0, %v3382_v20 }
  0xe9   : > { %v3556_v23 = vpop.eup %2840  ;;  %2439 = vmatmul.msk.bf16.gmra.mxu0 %vm479_vm0, %v3382_v20  ;;  %2447 = vmatmul.msk.bf16.gmra.mxu1 %vm479_vm0, %v3382_v20  ;;  %v2744_v20 = vld [vmem:[%s4070_s2 + $0xd8] sm:$0xff] }
  0xea   : > { %v3562_v24 = vpop.eup %2842  ;;  %v543_v25 = vpop.f32.mrf.mxu2  ;;  %v927_v27 = vpack.c.bf16 %v3556_v23, %v3536_v16  ;;  %1481 = vmatpush.bf16.msra.mxu1 %v2744_v20 }
  0xeb   : > { %v592_v26 = vpop.f32.mrf.mxu3  ;;  %v928_v28 = vpack.c.bf16 %v3562_v24, %v3551_v21  ;;  %2844 = vtanh.f32 %v543_v25 }
  0xec   : > { %2846 = vtanh.f32 %v592_v26 }
  0xee   : > { %1482 = vmatpush.bf16.msra.mxu1 %v2743_v33  ;;  %v525_v29 = vpop.f32.mrf.mxu0  ;;  %v2753_v33 = vld [vmem:[%s4070_s2 + $0x120] sm:$0xff] }
  0xef   : > { %1529 = vmatpush.bf16.msrb.mxu2 %v2753_v33  ;;  %v2751_v33 = vld [vmem:[%s4070_s2 + $0x110] sm:$0xff] }
  0xf1   : > { %v3586_v39 = vpop.eup %2844 }
  0xf2   : > { %v545_v34 = vpop.f32.mrf.mxu2  ;;  %v3592_v41 = vpop.eup %2846  ;;  %1483 = vmatpush.bf16.msra.mxu1 %v2742_v38 }
  0xf3   : > { %v594_v35 = vpop.f32.mrf.mxu3  ;;  %2848 = vtanh.f32 %v545_v34  ;;  %v2761_v34 = vld [vmem:[%s4070_s2 + $0x160] sm:$0xff] }
  0xf4   : > { %2850 = vtanh.f32 %v594_v35  ;;  %1578 = vmatpush.bf16.msrb.mxu3 %v2761_v34  ;;  %v2759_v34 = vld [vmem:[%s4070_s2 + $0x150] sm:$0xff] }
  0xf5   : > { %2852 = vtanh.f32 %v513_v12 }
  0xf6   : > { %2854 = vtanh.f32 %v562_v15  ;;  %1484 = vmatpush.bf16.msra.mxu1 %v2741_v43  ;;  %v572_v15 = vpop.f32.mrf.mxu1 }
  0xf7   : > { %2424 = vmatmul.msk.bf16.gmra.mxu2 %vm479_vm0, %v3404_v36  ;;  %2432 = vmatmul.msk.bf16.gmra.mxu3 %vm479_vm0, %v3404_v36  ;;  %2856 = vtanh.f32 %v515_v30 }
  0xf8   : > { %2858 = vtanh.f32 %v564_v32 }
  0xf9   : > { %v3600_v44 = vpop.eup %2848  ;;  %2440 = vmatmul.msk.bf16.gmra.mxu0 %vm479_vm0, %v3404_v36  ;;  %2448 = vmatmul.msk.bf16.gmra.mxu1 %vm479_vm0, %v3404_v36 }
  0xfa   : > { %v3606_v46 = vpop.eup %2850  ;;  %v548_v47 = vpop.f32.mrf.mxu2  ;;  %v933_v49 = vpack.c.bf16 %v3600_v44, %v3586_v39 }
  0xfb   : > { %v597_v48 = vpop.f32.mrf.mxu3  ;;  %v934_v36 = vpack.c.bf16 %v3606_v46, %v3592_v41  ;;  %v2853_v52 = vpop.eup %2852  ;;  %2860 = vtanh.f32 %v548_v47 }
  0xfc   : > { %v2855_v53 = vpop.eup %2854  ;;  %2862 = vtanh.f32 %v597_v48  ;;  %v528_v48 = vpop.f32.mrf.mxu0 }
  0xfd   : > { %v2857_v55 = vpop.eup %2856 }
  0xfe   : > { %v2859_v57 = vpop.eup %2858  ;;  %v897_v54 = vpack.c.bf16 %v2857_v55, %v2853_v52  ;;  %v574_v32 = vpop.f32.mrf.mxu1 }
  0xff   : > { %v898_v62 = vpack.c.bf16 %v2859_v57, %v2855_v53 }
 0x101   : > { %v3618_v2 = vpop.eup %2860 }
 0x102   : > { %v550_v58 = vpop.f32.mrf.mxu2  ;;  %v3626_v6 = vpop.eup %2862 }
 0x103   : > { %v599_v59 = vpop.f32.mrf.mxu3  ;;  %2864 = vtanh.f32 %v550_v58 }
 0x104   : > { %2866 = vtanh.f32 %v599_v59  ;;  %v530_v7 = vpop.f32.mrf.mxu0 }
 0x105   : > { %2868 = vtanh.f32 %v518_v40 }
 0x106   : > { %2870 = vtanh.f32 %v567_v45  ;;  %v577_v52 = vpop.f32.mrf.mxu1 }
 0x107   : > { %1338 = vmatmul.bf16.vlgmr.msra.gmra.mxu2 %v897_v54  ;;  %1387 = vmatmul.bf16.vlgmr.msra.gmra.mxu3 %v898_v62  ;;  %2872 = vtanh.f32 %v520_v56  ;;  %v2760_v54 = vld [vmem:[%s4070_s2 + $0x158] sm:$0xff] }
 0x108   : > { %2874 = vtanh.f32 %v569_v60  ;;  %v2752_v60 = vld [vmem:[%s4070_s2 + $0x118] sm:$0xff]  ;;  %1579 = vmatpush.bf16.msrb.mxu3 %v2760_v54 }
 0x109   : > { %v3628_v8 = vpop.eup %2864  ;;  %1530 = vmatpush.bf16.msrb.mxu2 %v2752_v60 }
 0x10a   : > { %v3630_v9 = vpop.eup %2866  ;;  %v611_v10 = vpop.f32.mrf.mxu2  ;;  %v939_v12 = vpack.c.bf16 %v3628_v8, %v3618_v2  ;;  %v2772_v8 = vld [vmem:[%s4071_s3 + $0x74] sm:$0xf0] }
 0x10b   : > { %v660_v11 = vpop.f32.mrf.mxu3  ;;  %v940_v14 = vpack.c.bf16 %v3630_v9, %v3626_v6  ;;  %v2869_v17 = vpop.eup %2868  ;;  %2876 = vtanh.f32 %v611_v10  ;;  %v2671_v6 = vld [vmem:[%s4071_s3 + $0x70] sm:$0xf] }
 0x10c   : > { %v2871_v18 = vpop.eup %2870  ;;  %2878 = vtanh.f32 %v660_v11  ;;  %1580 = vmatpush.bf16.msrb.mxu3 %v2759_v34  ;;  %v2672_v9 = vor.u32 %v2772_v8, %v2671_v6  ;;  %v2659_v8 = vld [vmem:[%s4071_s3 + $0x40] sm:$0xf] }
 0x10d   : > { %v2873_v19 = vpop.eup %2872  ;;  %1531 = vmatpush.bf16.msrb.mxu2 %v2751_v33 }
 0x10e   : > { %v2875_v22 = vpop.eup %2874  ;;  %v903_v20 = vpack.c.bf16 %v2873_v19, %v2869_v17  ;;  %v579_v17 = vpop.f32.mrf.mxu1  ;;  %1713 = vmatpush.bf16.msrb.mxu0 %v2672_v9  ;;  %v2769_v9 = vld [vmem:[%s4071_s3 + $0x44] sm:$0xf0] }
 0x10f   : > { %v904_v30 = vpack.c.bf16 %v2875_v22, %v2871_v18 }
 0x111   : > { %v2877_v31 = vpop.eup %2876 }
 0x112   : > { %v613_v25 = vpop.f32.mrf.mxu2  ;;  %v2879_v35 = vpop.eup %2878 }
 0x113   : > { %v662_v26 = vpop.f32.mrf.mxu3  ;;  %2880 = vtanh.f32 %v613_v25 }
 0x114   : > { %2882 = vtanh.f32 %v662_v26 }
 0x115   : > { %2884 = vtanh.f32 %v523_v13 }
 0x116   : > { %2886 = vtanh.f32 %v572_v15 }
 0x117   : > { %1343 = vmatmul.bf16.gmra.mxu2 %v903_v20  ;;  %1392 = vmatmul.bf16.gmra.mxu3 %v904_v30  ;;  %2888 = vtanh.f32 %v525_v29 }
 0x118   : > { %2890 = vtanh.f32 %v574_v32 }
 0x119   : > { %v2881_v37 = vpop.eup %2880 }
 0x11a   : > { %v2883_v38 = vpop.eup %2882  ;;  %v899_v40 = vpack.c.bf16 %v2881_v37, %v2877_v31  ;;  %v616_v42 = vpop.f32.mrf.mxu2 }
 0x11b   : > { %v665_v43 = vpop.f32.mrf.mxu3  ;;  %v900_v45 = vpack.c.bf16 %v2883_v38, %v2879_v35  ;;  %v2885_v47 = vpop.eup %2884  ;;  %2892 = vtanh.f32 %v616_v42 }
 0x11c   : > { %1436 = vmatmul.bf16.vlgmr.msra.gmra.mxu0 %v899_v40  ;;  %v2887_v50 = vpop.eup %2886  ;;  %2894 = vtanh.f32 %v665_v43 }
 0x11d   : > { %1485 = vmatmul.bf16.vlgmr.msra.gmra.mxu1 %v900_v45  ;;  %v2889_v51 = vpop.eup %2888 }
 0x11e   : > { %v2891_v53 = vpop.eup %2890  ;;  %v909_v57 = vpack.c.bf16 %v2889_v51, %v2885_v47 }
 0x11f   : > { %v910_v58 = vpack.c.bf16 %v2891_v53, %v2887_v50  ;;  %v3654_v50 = vpop.f32.mrf.mxu0  ;;  %v2750_v53 = vld [vmem:[%s4070_s2 + $0x108] sm:$0xff] }
 0x120   : > { %1532 = vmatpush.bf16.msrb.mxu2 %v2750_v53 }
 0x121   : > { %v2893_v59 = vpop.eup %2892 }
 0x122   : > { %v618_v55 = vpop.f32.mrf.mxu2  ;;  %v2895_v62 = vpop.eup %2894 }
 0x123   : > { %v667_v56 = vpop.f32.mrf.mxu3  ;;  %2896 = vtanh.f32 %v618_v55  ;;  %v2758_v55 = vld [vmem:[%s4070_s2 + $0x148] sm:$0xff] }
 0x124   : > { %2898 = vtanh.f32 %v667_v56  ;;  %1581 = vmatpush.bf16.msrb.mxu3 %v2758_v55  ;;  %v3731_v55 = vld [vmem:[%s4072_s4] ss:$0 sm:$0xff] }
 0x125   : > { %2900 = vtanh.f32 %v528_v48 }
 0x126   : > { %2902 = vtanh.f32 %v577_v52  ;;  %v3656_v52 = vpop.f32.mrf.mxu1 }
 0x127   : > { %1348 = vmatmul.bf16.gmra.mxu2 %v909_v57  ;;  %1397 = vmatmul.bf16.gmra.mxu3 %v910_v58  ;;  %2904 = vtanh.f32 %v530_v7  ;;  %v3670_v63 = vpop.f32.mrf.mxu0  ;;  %v2757_v7 = vld [vmem:[%s4070_s2 + $0x140] sm:$0xff] }
 0x128   : > { %2906 = vtanh.f32 %v579_v17  ;;  %1582 = vmatpush.bf16.msrb.mxu3 %v2757_v7 }
 0x129   : > { %v2897_v3 = vpop.eup %2896 }
 0x12a   : > { %v2899_v10 = vpop.eup %2898  ;;  %v621_v11 = vpop.f32.mrf.mxu2  ;;  %v905_v15 = vpack.c.bf16 %v2897_v3, %v2893_v59  ;;  %v2749_v3 = vld [vmem:[%s4070_s2 + $0x100] sm:$0xff] }
 0x12b   : > { %v670_v13 = vpop.f32.mrf.mxu3  ;;  %v906_v18 = vpack.c.bf16 %v2899_v10, %v2895_v62  ;;  %v2901_v19 = vpop.eup %2900  ;;  %2908 = vtanh.f32 %v621_v11  ;;  %1533 = vmatpush.bf16.msrb.mxu2 %v2749_v3 }
 0x12c   : > { %1441 = vmatmul.bf16.gmra.mxu0 %v905_v15  ;;  %v2903_v22 = vpop.eup %2902  ;;  %2910 = vtanh.f32 %v670_v13 }
 0x12d   : > { %1490 = vmatmul.bf16.gmra.mxu1 %v906_v18  ;;  %v2905_v25 = vpop.eup %2904 }
 0x12e   : > { %v2907_v26 = vpop.eup %2906  ;;  %v915_v30 = vpack.c.bf16 %v2905_v25, %v2901_v19  ;;  %v3672_v1 = vpop.f32.mrf.mxu1 }
 0x12f   : > { %v916_v31 = vpack.c.bf16 %v2907_v26, %v2903_v22  ;;  %v3674_v62 = vpop.f32.mrf.mxu0 }
 0x131   : > { %v2909_v32 = vpop.eup %2908 }
 0x132   : > { %v623_v29 = vpop.f32.mrf.mxu2  ;;  %v2911_v35 = vpop.eup %2910 }
 0x133   : > { %v672_v20 = vpop.f32.mrf.mxu3  ;;  %2912 = vtanh.f32 %v623_v29 }
 0x134   : > { %2914 = vtanh.f32 %v672_v20 }
 0x137   : > { %1353 = vmatmul.bf16.gmra.mxu2 %v915_v30  ;;  %1402 = vmatmul.bf16.gmra.mxu3 %v916_v31  ;;  %v3690_v24 = vpop.f32.mrf.mxu0 }
 0x139   : > { %v2913_v37 = vpop.eup %2912 }
 0x13a   : > { %v2915_v38 = vpop.eup %2914  ;;  %v626_v40 = vpop.f32.mrf.mxu2  ;;  %v911_v43 = vpack.c.bf16 %v2913_v37, %v2909_v32 }
 0x13b   : > { %v675_v42 = vpop.f32.mrf.mxu3  ;;  %v912_v45 = vpack.c.bf16 %v2915_v38, %v2911_v35  ;;  %2916 = vtanh.f32 %v626_v40 }
 0x13c   : > { %1446 = vmatmul.bf16.gmra.mxu0 %v911_v43  ;;  %2918 = vtanh.f32 %v675_v42 }
 0x13d   : > { %1495 = vmatmul.bf16.gmra.mxu1 %v912_v45 }
 0x13f   : > { %v3700_v31 = vpop.f32.mrf.mxu0 }
 0x141   : > { %v2917_v51 = vpop.eup %2916 }
 0x142   : > { %v628_v47 = vpop.f32.mrf.mxu2  ;;  %v2919_v56 = vpop.eup %2918 }
 0x143   : > { %v677_v48 = vpop.f32.mrf.mxu3  ;;  %2920 = vtanh.f32 %v628_v47 }
 0x144   : > { %2922 = vtanh.f32 %v677_v48 }
 0x147   : > { %1358 = vmatmul.bf16.gmra.mxu2 %v921_v4  ;;  %1407 = vmatmul.bf16.gmra.mxu3 %v922_v5  ;;  %v3704_v41 = vpop.f32.mrf.mxu0 }
 0x149   : > { %v2921_v57 = vpop.eup %2920 }
 0x14a   : > { %v2923_v58 = vpop.eup %2922  ;;  %v631_v59 = vpop.f32.mrf.mxu2  ;;  %v917_v0 = vpack.c.bf16 %v2921_v57, %v2917_v51 }
 0x14b   : > { %v680_v61 = vpop.f32.mrf.mxu3  ;;  %v918_v4 = vpack.c.bf16 %v2923_v58, %v2919_v56  ;;  %2924 = vtanh.f32 %v631_v59 }
 0x14c   : > { %1451 = vmatmul.bf16.gmra.mxu0 %v917_v0  ;;  %2926 = vtanh.f32 %v680_v61 }
 0x14d   : > { %1500 = vmatmul.bf16.gmra.mxu1 %v918_v4 }
 0x151   : > { %v2925_v54 = vpop.eup %2924 }
 0x152   : > { %v633_v5 = vpop.f32.mrf.mxu2  ;;  %v2927_v10 = vpop.eup %2926 }
 0x153   : > { %v682_v60 = vpop.f32.mrf.mxu3  ;;  %2928 = vtanh.f32 %v633_v5 }
 0x154   : > { %2930 = vtanh.f32 %v682_v60 }
 0x157   : > { %1363 = vmatmul.bf16.gmra.mxu2 %v927_v27  ;;  %1412 = vmatmul.bf16.gmra.mxu3 %v928_v28  ;;  %v3688_v27 = vpop.f32.mrf.mxu1 }
 0x159   : > { %v2929_v11 = vpop.eup %2928 }
 0x15a   : > { %v2931_v13 = vpop.eup %2930  ;;  %v636_v15 = vpop.f32.mrf.mxu2  ;;  %v923_v23 = vpack.c.bf16 %v2929_v11, %v2925_v54  ;;  %v2667_v54 = vld [vmem:[%s4071_s3 + $0x60] sm:$0xf] }
 0x15b   : > { %v685_v16 = vpop.f32.mrf.mxu3  ;;  %v924_v21 = vpack.c.bf16 %v2931_v13, %v2927_v10  ;;  %2932 = vtanh.f32 %v636_v15 }
 0x15c   : > { %1456 = vmatmul.bf16.gmra.mxu0 %v923_v23  ;;  %2934 = vtanh.f32 %v685_v16 }
 0x15d   : > { %1505 = vmatmul.bf16.gmra.mxu1 %v924_v21 }
 0x15f   : > { %v3692_v18 = vpop.f32.mrf.mxu1 }
 0x161   : > { %v2933_v19 = vpop.eup %2932 }
 0x162   : > { %v638_v28 = vpop.f32.mrf.mxu2  ;;  %v2935_v22 = vpop.eup %2934 }
 0x163   : > { %v687_v17 = vpop.f32.mrf.mxu3  ;;  %2936 = vtanh.f32 %v638_v28 }
 0x164   : > { %2938 = vtanh.f32 %v687_v17 }
 0x167   : > { %1368 = vmatmul.bf16.gmra.mxu2 %v933_v49  ;;  %1417 = vmatmul.bf16.gmra.mxu3 %v934_v36  ;;  %v3702_v33 = vpop.f32.mrf.mxu1 }
 0x169   : > { %v2937_v25 = vpop.eup %2936 }
 0x16a   : > { %v2939_v26 = vpop.eup %2938  ;;  %v641_v29 = vpop.f32.mrf.mxu2  ;;  %v929_v30 = vpack.c.bf16 %v2937_v25, %v2933_v19 }
 0x16b   : > { %v690_v20 = vpop.f32.mrf.mxu3  ;;  %v930_v32 = vpack.c.bf16 %v2939_v26, %v2935_v22  ;;  %2940 = vtanh.f32 %v641_v29  ;;  %v2663_v26 = vld [vmem:[%s4071_s3 + $0x50] sm:$0xf]  ;;  %v2770_v29 = vld [vmem:[%s4071_s3 + $0x54] sm:$0xf0] }
 0x16c   : > { %1461 = vmatmul.bf16.gmra.mxu0 %v929_v30  ;;  %2942 = vtanh.f32 %v690_v20  ;;  %v2664_v30 = vor.u32 %v2770_v29, %v2663_v26  ;;  %v2651_v29 = vld [vmem:[%s4071_s3 + $0x20] sm:$0xf] }
 0x16d   : > { %1510 = vmatmul.bf16.gmra.mxu1 %v930_v32 }
 0x16f   : > { %v3713_v34 = vpop.f32.mrf.mxu1 }
 0x171   : > { %v2941_v46 = vpop.eup %2940 }
 0x172   : > { %v643_v39 = vpop.f32.mrf.mxu2  ;;  %v2943_v49 = vpop.eup %2942 }
 0x173   : > { %v692_v44 = vpop.f32.mrf.mxu3  ;;  %2944 = vtanh.f32 %v643_v39 }
 0x174   : > { %2946 = vtanh.f32 %v692_v44 }
 0x175   : > { %2948 = vtanh.f32 %v3654_v50 }
 0x176   : > { %2950 = vtanh.f32 %v3656_v52 }
 0x177   : > { %1373 = vmatmul.bf16.gmra.mxu2 %v939_v12  ;;  %1422 = vmatmul.bf16.gmra.mxu3 %v940_v14  ;;  %2952 = vtanh.f32 %v3670_v63  ;;  %v3724_v14 = vpop.f32.mrf.mxu0  ;;  %v3726_v50 = vpop.f32.mrf.mxu1 }
 0x178   : > { %2954 = vtanh.f32 %v3672_v1 }
 0x179   : > { %v2945_v36 = vpop.eup %2944 }
 0x17a   : > { %v2947_v35 = vpop.eup %2946  ;;  %v646_v37 = vpop.f32.mrf.mxu2  ;;  %v935_v40 = vpack.c.bf16 %v2945_v36, %v2941_v46 }
 0x17b   : > { %v695_v38 = vpop.f32.mrf.mxu3  ;;  %v936_v2 = vpack.c.bf16 %v2947_v35, %v2943_v49  ;;  %v2949_v12 = vpop.eup %2948  ;;  %2956 = vtanh.f32 %v646_v37 }
 0x17c   : > { %1466 = vmatmul.bf16.gmra.mxu0 %v935_v40  ;;  %v2951_v42 = vpop.eup %2950  ;;  %2958 = vtanh.f32 %v695_v38 }
 0x17d   : > { %1515 = vmatmul.bf16.gmra.mxu1 %v936_v2  ;;  %v2953_v43 = vpop.eup %2952 }
 0x17e   : > { %v2955_v45 = vpop.eup %2954  ;;  %v901_v51 = vpack.c.bf16 %v2953_v43, %v2949_v12 }
 0x17f   : > { %v902_v52 = vpack.c.bf16 %v2955_v45, %v2951_v42  ;;  %v726_v58 = vpop.f32.mrf.mxu0  ;;  %v775_v5 = vpop.f32.mrf.mxu1 }
 0x181   : > { %v2957_v53 = vpop.eup %2956 }
 0x182   : > { %v648_v47 = vpop.f32.mrf.mxu2  ;;  %v2959_v56 = vpop.eup %2958 }
 0x183   : > { %v697_v48 = vpop.f32.mrf.mxu3  ;;  %2960 = vtanh.f32 %v648_v47 }
 0x184   : > { %2962 = vtanh.f32 %v697_v48 }
 0x185   : > { %2964 = vtanh.f32 %v3674_v62  ;;  %v2771_v62 = vld [vmem:[%s4071_s3 + $0x64] sm:$0xf0] }
 0x186   : > { %2966 = vtanh.f32 %v3688_v27  ;;  %v2668_v3 = vor.u32 %v2771_v62, %v2667_v54 }
 0x187   : > { %1534 = vmatmul.bf16.vlgmr.msrb.gmra.mxu2 %v901_v51  ;;  %1583 = vmatmul.bf16.vlgmr.msrb.gmra.mxu3 %v902_v52  ;;  %2968 = vtanh.f32 %v3690_v24  ;;  %v729_v27 = vpop.f32.mrf.mxu0  ;;  %v778_v17 = vpop.f32.mrf.mxu1 }
 0x188   : > { %2970 = vtanh.f32 %v3692_v18  ;;  %1714 = vmatpush.bf16.msrb.mxu0 %v2668_v3 }
 0x189   : > { %v2961_v57 = vpop.eup %2960  ;;  %2972 = vtanh.f32 %v3700_v31 }
 0x18a   : > { %v2963_v59 = vpop.eup %2962  ;;  %v1339_v61 = vpop.f32.mrf.mxu2  ;;  %v941_v4 = vpack.c.bf16 %v2961_v57, %v2957_v53  ;;  %2974 = vtanh.f32 %v3702_v33 }
 0x18b   : > { %v1388_v0 = vpop.f32.mrf.mxu3  ;;  %v1340_v63 = vadd.f32 %v3731_v55, %v1339_v61  ;;  %v942_v1 = vpack.c.bf16 %v2963_v59, %v2959_v56  ;;  %v2965_v7 = vpop.eup %2964  ;;  %2976 = vtanh.f32 %v3704_v41 }
 0x18c   : > { %1471 = vmatmul.bf16.gmra.mxu0 %v941_v4  ;;  %v2967_v10 = vpop.eup %2966  ;;  %2978 = vtanh.f32 %v3713_v34 }
 0x18d   : > { %v3738_v60 = vadd.f32 %v1388_v0, %v1340_v63  ;;  %1520 = vmatmul.bf16.gmra.mxu1 %v942_v1  ;;  %v2969_v11 = vpop.eup %2968  ;;  %1715 = vmatpush.bf16.msrb.mxu0 %v2664_v30  ;;  %2980 = vtanh.f32 %v3724_v14  ;;  %v2660_v14 = vor.u32 %v2769_v9, %v2659_v8  ;;  %v2655_v1 = vld [vmem:[%s4071_s3 + $0x30] sm:$0xf] }
 0x18e   : > { %v2971_v13 = vpop.eup %2970  ;;  %v907_v24 = vpack.c.bf16 %v2969_v11, %v2965_v7  ;;  %2982 = vtanh.f32 %v3726_v50 }
 0x18f   : > { %v908_v28 = vpack.c.bf16 %v2971_v13, %v2967_v10  ;;  %v731_v20 = vpop.f32.mrf.mxu0  ;;  %v2973_v31 = vpop.eup %2972  ;;  %2984 = vtanh.f32 %v726_v58 }
 0x190   : > { %v2975_v32 = vpop.eup %2974  ;;  %v780_v49 = vpop.f32.mrf.mxu1  ;;  %2986 = vtanh.f32 %v775_v5  ;;  %v2768_v5 = vld [vmem:[%s4071_s3 + $0x34] sm:$0xf0] }
 0x191   : > { %v2977_v33 = vpop.eup %2976  ;;  %1716 = vmatpush.bf16.msrb.mxu0 %v2660_v14  ;;  %2988 = vtanh.f32 %v729_v27  ;;  %v2656_v54 = vor.u32 %v2768_v5, %v2655_v1  ;;  %v2647_v14 = vld [vmem:[%s4071_s3 + $0x10] sm:$0xf] }
 0x192   : > { %v1341_v15 = vpop.f32.mrf.mxu2  ;;  %v2979_v39 = vpop.eup %2978  ;;  %v913_v34 = vpack.c.bf16 %v2977_v33, %v2973_v31  ;;  %2990 = vtanh.f32 %v778_v17 }
 0x193   : > { %v1390_v16 = vpop.f32.mrf.mxu3  ;;  %v1342_v23 = vadd.f32 %v3731_v55, %v1341_v15  ;;  %v914_v35 = vpack.c.bf16 %v2979_v39, %v2975_v32  ;;  %v2981_v42 = vpop.eup %2980  ;;  %2992 = vtanh.f32 %v731_v20  ;;  %v2767_v20 = vld [vmem:[%s4071_s3 + $0x24] sm:$0xf0] }
 0x194   : > { %v2983_v43 = vpop.eup %2982  ;;  %2994 = vtanh.f32 %v780_v49  ;;  %v2652_v30 = vor.u32 %v2767_v20, %v2651_v29 }
 0x195   : > { %v3747_v21 = vadd.f32 %v1390_v16, %v1342_v23  ;;  %v2985_v45 = vpop.eup %2984  ;;  %1717 = vmatpush.bf16.msrb.mxu0 %v2656_v54 }
 0x196   : > { %v2987_v47 = vpop.eup %2986  ;;  %v919_v56 = vpack.c.bf16 %v2985_v45, %v2981_v42  ;;  %v2766_v42 = vld [vmem:[%s4071_s3 + $0x14] sm:$0xf0] }
 0x197   : > { %1539 = vmatmul.bf16.gmra.mxu2 %v907_v24  ;;  %1588 = vmatmul.bf16.gmra.mxu3 %v908_v28  ;;  %v734_v37 = vpop.f32.mrf.mxu0  ;;  %v920_v57 = vpack.c.bf16 %v2987_v47, %v2983_v43  ;;  %v2989_v62 = vpop.eup %2988  ;;  %v2648_v43 = vor.u32 %v2766_v42, %v2647_v14 }
 0x198   : > { %v783_v12 = vpop.f32.mrf.mxu1  ;;  %v2991_v3 = vpop.eup %2990  ;;  %2996 = vtanh.f32 %v734_v37 }
 0x199   : > { %v2993_v7 = vpop.eup %2992  ;;  %2998 = vtanh.f32 %v783_v12  ;;  %1718 = vmatpush.bf16.msrb.mxu0 %v2652_v30 }
 0x19a   : > { %v1344_v18 = vpop.f32.mrf.mxu2  ;;  %v2995_v10 = vpop.eup %2994  ;;  %v925_v27 = vpack.c.bf16 %v2993_v7, %v2989_v62 }
 0x19b   : > { %v1345_v19 = vadd.f32 %v3731_v55, %v1344_v18  ;;  %v1393_v22 = vpop.f32.mrf.mxu3  ;;  %v926_v24 = vpack.c.bf16 %v2995_v10, %v2991_v3  ;;  %v2643_v10 = vld [vmem:[%s4071_s3] sm:$0xf] }
 0x19d   : > { %v3754_v25 = vadd.f32 %v1393_v22, %v1345_v19  ;;  %1719 = vmatpush.bf16.msrb.mxu0 %v2648_v43 }
 0x19e   : > { %v2997_v31 = vpop.eup %2996 }
 0x19f   : > { %v736_v48 = vpop.f32.mrf.mxu0  ;;  %v2999_v32 = vpop.eup %2998 }
 0x1a0   : > { %v785_v58 = vpop.f32.mrf.mxu1  ;;  %3000 = vtanh.f32 %v736_v48 }
 0x1a1   : > { %3002 = vtanh.f32 %v785_v58 }
 0x1a2   : > { %v1346_v44 = vpop.f32.mrf.mxu2 }
 0x1a3   : > { %v1347_v41 = vadd.f32 %v3731_v55, %v1346_v44  ;;  %v1395_v46 = vpop.f32.mrf.mxu3 }
 0x1a5   : > { %v3763_v36 = vadd.f32 %v1395_v46, %v1347_v41 }
 0x1a6   : > { %v3001_v39 = vpop.eup %3000 }
 0x1a7   : > { %1544 = vmatmul.bf16.gmra.mxu2 %v913_v34  ;;  %1593 = vmatmul.bf16.gmra.mxu3 %v914_v35  ;;  %v739_v4 = vpop.f32.mrf.mxu0  ;;  %v3003_v44 = vpop.eup %3002  ;;  %v931_v35 = vpack.c.bf16 %v3001_v39, %v2997_v31 }
 0x1a8   : > { %v788_v11 = vpop.f32.mrf.mxu1  ;;  %v932_v37 = vpack.c.bf16 %v3003_v44, %v2999_v32  ;;  %3004 = vtanh.f32 %v739_v4 }
 0x1a9   : > { %3006 = vtanh.f32 %v788_v11  ;;  %v2765_v11 = vld [vmem:[%s4071_s3 + $0x4] sm:$0xf0] }
 0x1aa   : > { %v1349_v38 = vpop.f32.mrf.mxu2 }
 0x1ab   : > { %v1350_v40 = vadd.f32 %v3731_v55, %v1349_v38  ;;  %v1398_v2 = vpop.f32.mrf.mxu3 }
 0x1ad   : > { %v3768_v6 = vadd.f32 %v1398_v2, %v1350_v40 }
 0x1ae   : > { %v3005_v45 = vpop.eup %3004 }
 0x1af   : > { %v741_v28 = vpop.f32.mrf.mxu0  ;;  %v3007_v47 = vpop.eup %3006 }
 0x1b0   : > { %v790_v22 = vpop.f32.mrf.mxu1  ;;  %3008 = vtanh.f32 %v741_v28 }
 0x1b1   : > { %3010 = vtanh.f32 %v790_v22 }
 0x1b2   : > { %v1351_v50 = vpop.f32.mrf.mxu2 }
 0x1b3   : > { %v1352_v51 = vadd.f32 %v3731_v55, %v1351_v50  ;;  %v1400_v52 = vpop.f32.mrf.mxu3 }
 0x1b5   : > { %v3777_v53 = vadd.f32 %v1400_v52, %v1352_v51 }
 0x1b6   : > { %v3009_v50 = vpop.eup %3008 }
 0x1b7   : > { %1549 = vmatmul.bf16.gmra.mxu2 %v919_v56  ;;  %1598 = vmatmul.bf16.gmra.mxu3 %v920_v57  ;;  %v744_v33 = vpop.f32.mrf.mxu0  ;;  %v3011_v51 = vpop.eup %3010 }
 0x1b8   : > { %v793_v38 = vpop.f32.mrf.mxu1  ;;  %3012 = vtanh.f32 %v744_v33 }
 0x1b9   : > { %3014 = vtanh.f32 %v793_v38 }
 0x1ba   : > { %v1354_v59 = vpop.f32.mrf.mxu2 }
 0x1bb   : > { %v1355_v61 = vadd.f32 %v3731_v55, %v1354_v59  ;;  %v1403_v0 = vpop.f32.mrf.mxu3 }
 0x1bd   : > { %v3780_v63 = vadd.f32 %v1403_v0, %v1355_v61  ;;  %v937_v61 = vpack.c.bf16 %v3009_v50, %v3005_v45  ;;  %v938_v0 = vpack.c.bf16 %v3011_v51, %v3007_v47 }
 0x1be   : > { %v3013_v7 = vpop.eup %3012 }
 0x1bf   : > { %v746_v40 = vpop.f32.mrf.mxu0 }
 0x1c0   : > { %v795_v48 = vpop.f32.mrf.mxu1  ;;  %3016 = vtanh.f32 %v746_v40  ;;  %v2703_v40 = vld [vmem:[%s4071_s3 + $0x74] sm:$0xf] }
 0x1c1   : > { %3018 = vtanh.f32 %v795_v48 }
 0x1c2   : > { %v1356_v13 = vpop.f32.mrf.mxu2 }
 0x1c3   : > { %v1357_v15 = vadd.f32 %v3731_v55, %v1356_v13  ;;  %v1405_v16 = vpop.f32.mrf.mxu3  ;;  %v3015_v13 = vpop.eup %3014 }
 0x1c5   : > { %v3789_v23 = vadd.f32 %v1405_v16, %v1357_v15  ;;  %v2644_v15 = vor.u32 %v2765_v11, %v2643_v10 }
 0x1c6   : > { %v3017_v16 = vpop.eup %3016 }
 0x1c7   : > { %1554 = vmatmul.bf16.gmra.mxu2 %v925_v27  ;;  %1603 = vmatmul.bf16.gmra.mxu3 %v926_v24  ;;  %v1437_v58 = vpop.f32.mrf.mxu0  ;;  %v3019_v27 = vpop.eup %3018  ;;  %v943_v22 = vpack.c.bf16 %v3017_v16, %v3013_v7 }
 0x1c8   : > { %v1486_v4 = vpop.f32.mrf.mxu1  ;;  %1720 = vmatpush.bf16.msrb.mxu0 %v2644_v15  ;;  %v944_v29 = vpack.c.bf16 %v3019_v27, %v3015_v13  ;;  %v1438_v38 = vadd.f32 %v1437_v58, %v3738_v60 }
 0x1ca   : > { %v1359_v17 = vpop.f32.mrf.mxu2 }
 0x1cb   : > { %v1360_v18 = vadd.f32 %v3731_v55, %v1359_v17  ;;  %v1408_v19 = vpop.f32.mrf.mxu3 }
 0x1cd   : > { %v3792_v26 = vadd.f32 %v1408_v19, %v1360_v18 }
 0x1cf   : > { %v1439_v3 = vpop.f32.mrf.mxu0 }
 0x1d0   : > { %v1488_v18 = vpop.f32.mrf.mxu1  ;;  %v1440_v43 = vadd.f32 %v1439_v3, %v3747_v21  ;;  %v2779_v21 = vld [vmem:[%s4071_s3 + $0x68] sm:$0xf0] }
 0x1d2   : > { %v1361_v41 = vpop.f32.mrf.mxu2  ;;  %v1489_v47 = vadd.f32 %v1488_v18, %v1440_v43 }
 0x1d3   : > { %v1362_v46 = vadd.f32 %v3731_v55, %v1361_v41  ;;  %v1410_v49 = vpop.f32.mrf.mxu3 }
 0x1d5   : > { %v3801_v34 = vadd.f32 %v1410_v49, %v1362_v46 }
 0x1d7   : > { %1559 = vmatmul.bf16.gmra.mxu2 %v931_v35  ;;  %1608 = vmatmul.bf16.gmra.mxu3 %v932_v37  ;;  %v1442_v20 = vpop.f32.mrf.mxu0 }
 0x1d8   : > { %v1491_v39 = vpop.f32.mrf.mxu1 }
 0x1da   : > { %v1364_v2 = vpop.f32.mrf.mxu2 }
 0x1db   : > { %v1365_v8 = vadd.f32 %v3731_v55, %v1364_v2  ;;  %v1413_v9 = vpop.f32.mrf.mxu3  ;;  %v2780_v2 = vld [vmem:[%s4071_s3 + $0x78] sm:$0xf0] }
 0x1dd   : > { %v3804_v12 = vadd.f32 %v1413_v9, %v1365_v8  ;;  %v2704_v9 = vor.u32 %v2780_v2, %v2703_v40 }
 0x1df   : > { %v1444_v44 = vpop.f32.mrf.mxu0  ;;  %1851 = vmatpush.bf16.msrb.mxu1 %v2704_v9 }
 0x1e0   : > { %v1493_v37 = vpop.f32.mrf.mxu1  ;;  %v1445_v11 = vadd.f32 %v1444_v44, %v3763_v36  ;;  %v2778_v36 = vld [vmem:[%s4071_s3 + $0x58] sm:$0xf0] }
 0x1e2   : > { %v1366_v52 = vpop.f32.mrf.mxu2  ;;  %v1494_v15 = vadd.f32 %v1493_v37, %v1445_v11 }
 0x1e3   : > { %v1367_v56 = vadd.f32 %v3731_v55, %v1366_v52  ;;  %v1415_v57 = vpop.f32.mrf.mxu3 }
 0x1e5   : > { %v3813_v59 = vadd.f32 %v1415_v57, %v1367_v56 }
 0x1e7   : > { %1564 = vmatmul.bf16.gmra.mxu2 %v937_v61  ;;  %1613 = vmatmul.bf16.gmra.mxu3 %v938_v0  ;;  %v1447_v42 = vpop.f32.mrf.mxu0  ;;  %v1443_v0 = vadd.f32 %v1442_v20, %v3754_v25 }
 0x1e8   : > { %v1496_v48 = vpop.f32.mrf.mxu1  ;;  %v1448_v20 = vadd.f32 %v1447_v42, %v3768_v6 }
 0x1e9   : > { %v1492_v10 = vadd.f32 %v1491_v39, %v1443_v0 }
 0x1ea   : > { %v1369_v1 = vpop.f32.mrf.mxu2 }
 0x1eb   : > { %v1370_v5 = vadd.f32 %v3731_v55, %v1369_v1  ;;  %v1418_v54 = vpop.f32.mrf.mxu3 }
 0x1ed   : > { %v3816_v62 = vadd.f32 %v1418_v54, %v1370_v5 }
 0x1ef   : > { %v1449_v57 = vpop.f32.mrf.mxu0 }
 0x1f0   : > { %v1498_v7 = vpop.f32.mrf.mxu1 }
 0x1f2   : > { %v1371_v24 = vpop.f32.mrf.mxu2 }
 0x1f3   : > { %v1372_v28 = vadd.f32 %v3731_v55, %v1371_v24  ;;  %v1420_v17 = vpop.f32.mrf.mxu3 }
 0x1f5   : > { %v3825_v19 = vadd.f32 %v1420_v17, %v1372_v28 }
 0x1f7   : > { %1569 = vmatmul.bf16.gmra.mxu2 %v943_v22  ;;  %1618 = vmatmul.bf16.gmra.mxu3 %v944_v29  ;;  %v1452_v25 = vpop.f32.mrf.mxu0 }
 0x1f8   : > { %v1501_v18 = vpop.f32.mrf.mxu1 }
 0x1fa   : > { %v1374_v30 = vpop.f32.mrf.mxu2 }
 0x1fb   : > { %v1375_v31 = vadd.f32 %v3731_v55, %v1374_v30  ;;  %v1423_v32 = vpop.f32.mrf.mxu3 }
 0x1fd   : > { %v3828_v33 = vadd.f32 %v1423_v32, %v1375_v31  ;;  %v2695_v31 = vld [vmem:[%s4071_s3 + $0x54] sm:$0xf] }
 0x1fe   : > { %v2696_v44 = vor.u32 %v2778_v36, %v2695_v31 }
 0x1ff   : > { %v1454_v32 = vpop.f32.mrf.mxu0 }
 0x200   : > { %v1503_v6 = vpop.f32.mrf.mxu1 }
 0x202   : > { %v1376_v41 = vpop.f32.mrf.mxu2 }
 0x203   : > { %v1377_v46 = vadd.f32 %v3731_v55, %v1376_v41  ;;  %v1425_v49 = vpop.f32.mrf.mxu3  ;;  %v1487_v55 = vadd.f32 %v1486_v4, %v1438_v38  ;;  %v2699_v4 = vld [vmem:[%s4071_s3 + $0x64] sm:$0xf] }
 0x204   : > { %v2700_v54 = vor.u32 %v2779_v21, %v2699_v4 }
 0x205   : > { %v3831_v35 = vadd.f32 %v1425_v49, %v1377_v46  ;;  %v1497_v46 = vadd.f32 %v1496_v48, %v1448_v20  ;;  %v1450_v49 = vadd.f32 %v1449_v57, %v3777_v53  ;;  %v2691_v48 = vld [vmem:[%s4071_s3 + $0x44] sm:$0xf]  ;;  %v2777_v53 = vld [vmem:[%s4071_s3 + $0x48] sm:$0xf0]  ;;  %v1455_v57 = vadd.f32 %v1454_v32, %v3789_v23  ;;  %v2776_v23 = vld [vmem:[%s4071_s3 + $0x38] sm:$0xf0] }
 0x206   : > { %1852 = vmatpush.bf16.msrb.mxu1 %v2700_v54 }
 0x207   : > { %v1499_v38 = vadd.f32 %v1498_v7, %v1450_v49  ;;  %v2683_v49 = vld [vmem:[%s4071_s3 + $0x24] sm:$0xf] }
 0x20a   : > { %v1535_v8 = vpop.f32.mrf.mxu2  ;;  %1853 = vmatpush.bf16.msrb.mxu1 %v2696_v44 }
 0x20b   : > { %v1584_v14 = vpop.f32.mrf.mxu3  ;;  %v1536_v45 = vadd.f32 %v1535_v8, %v1487_v55 }
 0x20d   : > { %v1585_v50 = vadd.f32 %v1584_v14, %v1536_v45  ;;  %v1457_v14 = vpop.f32.mrf.mxu0  ;;  %v1453_v45 = vadd.f32 %v1452_v25, %v3780_v63  ;;  %v2687_v25 = vld [vmem:[%s4071_s3 + $0x34] sm:$0xf] }
 0x20e   : > { %v1458_v11 = vadd.f32 %v1457_v14, %v3792_v26 }
 0x20f   : > { %v1624_v58 = vmax.f32 %v1585_v50, 0.0 }
 0x212   : > { %v1537_v60 = vpop.f32.mrf.mxu2 }
 0x213   : > { %v1538_v51 = vadd.f32 %v1537_v60, %v1489_v47  ;;  %v1586_v52 = vpop.f32.mrf.mxu3  ;;  %v1506_v60 = vpop.f32.mrf.mxu1 }
 0x215   : > { %v1587_v56 = vadd.f32 %v1586_v52, %v1538_v51  ;;  %v2692_v51 = vor.u32 %v2777_v53, %v2691_v48 }
 0x217   : > { %v1625_v61 = vmax.f32 %v1587_v56, 0.0  ;;  %1854 = vmatpush.bf16.msrb.mxu1 %v2692_v51  ;;  %v1502_v56 = vadd.f32 %v1501_v18, %v1453_v45 }
 0x219   : > { %v1640_v1 = vpack.c.bf16 %v1625_v61, %v1624_v58  ;;  %v1459_v58 = vpop.f32.mrf.mxu0  ;;  %v1504_v61 = vadd.f32 %v1503_v6, %v1455_v57 }
 0x21a   : > { %v1540_v5 = vpop.f32.mrf.mxu2 }
 0x21b   : > { %v1589_v3 = vpop.f32.mrf.mxu3  ;;  %1721 = vmatmul.bf16.vlgmr.msrb.gmra.mxu0 %v1640_v1  ;;  %v1541_v13 = vadd.f32 %v1540_v5, %v1492_v10  ;;  %v1508_v5 = vpop.f32.mrf.mxu1 }
 0x21d   : > { %v1590_v27 = vadd.f32 %v1589_v3, %v1541_v13 }
 0x21f   : > { %v1626_v22 = vmax.f32 %v1590_v27, 0.0 }
 0x221   : > { %v1462_v10 = vpop.f32.mrf.mxu0 }
 0x222   : > { %v1542_v16 = vpop.f32.mrf.mxu2 }
 0x223   : > { %v1543_v24 = vadd.f32 %v1542_v16, %v1494_v15  ;;  %v1591_v28 = vpop.f32.mrf.mxu3  ;;  %v2688_v16 = vor.u32 %v2776_v23, %v2687_v25 }
 0x225   : > { %v1592_v17 = vadd.f32 %v1591_v28, %v1543_v24  ;;  %1855 = vmatpush.bf16.msrb.mxu1 %v2688_v16  ;;  %v1507_v24 = vadd.f32 %v1506_v60, %v1458_v11  ;;  %v1460_v28 = vadd.f32 %v1459_v58, %v3801_v34  ;;  %v2775_v34 = vld [vmem:[%s4071_s3 + $0x28] sm:$0xf0] }
 0x226   : > { %v2684_v6 = vor.u32 %v2775_v34, %v2683_v49 }
 0x227   : > { %v1627_v29 = vmax.f32 %v1592_v17, 0.0  ;;  %v1511_v17 = vpop.f32.mrf.mxu1  ;;  %v1509_v26 = vadd.f32 %v1508_v5, %v1460_v28 }
 0x229   : > { %v1641_v30 = vpack.c.bf16 %v1627_v29, %v1626_v22  ;;  %v1464_v22 = vpop.f32.mrf.mxu0  ;;  %1856 = vmatpush.bf16.msrb.mxu1 %v2684_v6 }
 0x22a   : > { %v1545_v39 = vpop.f32.mrf.mxu2 }
 0x22b   : > { %v1594_v41 = vpop.f32.mrf.mxu3  ;;  %1726 = vmatmul.bf16.gmra.mxu0 %v1641_v30  ;;  %v1546_v37 = vadd.f32 %v1545_v39, %v1497_v46 }
 0x22d   : > { %v1595_v2 = vadd.f32 %v1594_v41, %v1546_v37  ;;  %v1463_v41 = vadd.f32 %v1462_v10, %v3804_v12 }
 0x22f   : > { %v1628_v55 = vmax.f32 %v1595_v2, 0.0  ;;  %v1513_v44 = vpop.f32.mrf.mxu1  ;;  %v1512_v2 = vadd.f32 %v1511_v17, %v1463_v41 }
 0x232   : > { %v1547_v40 = vpop.f32.mrf.mxu2 }
 0x233   : > { %v1548_v8 = vadd.f32 %v1547_v40, %v1499_v38  ;;  %v1596_v9 = vpop.f32.mrf.mxu3  ;;  %v1467_v40 = vpop.f32.mrf.mxu0 }
 0x235   : > { %v1597_v42 = vadd.f32 %v1596_v9, %v1548_v8  ;;  %v1465_v8 = vadd.f32 %v1464_v22, %v3813_v59  ;;  %v2774_v59 = vld [vmem:[%s4071_s3 + $0x18] sm:$0xf0] }
 0x237   : > { %v1629_v43 = vmax.f32 %v1597_v42, 0.0  ;;  %v1514_v12 = vadd.f32 %v1513_v44, %v1465_v8  ;;  %v1516_v14 = vpop.f32.mrf.mxu1 }
 0x239   : > { %v1642_v47 = vpack.c.bf16 %v1629_v43, %v1628_v55 }
 0x23a   : > { %v1550_v50 = vpop.f32.mrf.mxu2 }
 0x23b   : > { %v1599_v52 = vpop.f32.mrf.mxu3  ;;  %1731 = vmatmul.bf16.gmra.mxu0 %v1642_v47  ;;  %v1551_v63 = vadd.f32 %v1550_v50, %v1502_v56  ;;  %v1469_v48 = vpop.f32.mrf.mxu0  ;;  %v1468_v50 = vadd.f32 %v1467_v40, %v3816_v62  ;;  %v2773_v62 = vld [vmem:[%s4071_s3 + $0x8] sm:$0xf0] }
 0x23d   : > { %v1600_v1 = vadd.f32 %v1599_v52, %v1551_v63  ;;  %v2679_v52 = vld [vmem:[%s4071_s3 + $0x14] sm:$0xf]  ;;  %v2675_v63 = vld [vmem:[%s4071_s3 + $0x4] sm:$0xf] }
 0x23e   : > { %v2680_v57 = vor.u32 %v2774_v59, %v2679_v52 }
 0x23f   : > { %v1630_v3 = vmax.f32 %v1600_v1, 0.0  ;;  %v1517_v1 = vadd.f32 %v1516_v14, %v1468_v50 }
 0x240   : > { %1857 = vmatpush.bf16.msrb.mxu1 %v2680_v57 }
 0x242   : > { %v1552_v0 = vpop.f32.mrf.mxu2 }
 0x243   : > { %v1553_v4 = vadd.f32 %v1552_v0, %v1504_v61  ;;  %v1601_v21 = vpop.f32.mrf.mxu3  ;;  %v1518_v61 = vpop.f32.mrf.mxu1  ;;  %v2676_v0 = vor.u32 %v2773_v62, %v2675_v63 }
 0x244   : > { %v1472_v5 = vpop.f32.mrf.mxu0 }
 0x245   : > { %v1602_v54 = vadd.f32 %v1601_v21, %v1553_v4  ;;  %v1470_v4 = vadd.f32 %v1469_v48, %v3825_v19  ;;  %1858 = vmatpush.bf16.msrb.mxu1 %v2676_v0  ;;  %v1473_v16 = vadd.f32 %v1472_v5, %v3828_v33 }
 0x247   : > { %v1631_v7 = vmax.f32 %v1602_v54, 0.0  ;;  %v1519_v54 = vadd.f32 %v1518_v61, %v1470_v4 }
 0x249   : > { %v1643_v13 = vpack.c.bf16 %v1631_v7, %v1630_v3 }
 0x24a   : > { %v1555_v15 = vpop.f32.mrf.mxu2 }
 0x24b   : > { %v1604_v27 = vpop.f32.mrf.mxu3  ;;  %1736 = vmatmul.bf16.gmra.mxu0 %v1643_v13  ;;  %v1556_v18 = vadd.f32 %v1555_v15, %v1507_v24  ;;  %v1521_v25 = vpop.f32.mrf.mxu1 }
 0x24c   : > { %v1474_v24 = vpop.f32.mrf.mxu0  ;;  %v1522_v19 = vadd.f32 %v1521_v25, %v1473_v16 }
 0x24d   : > { %v1605_v20 = vadd.f32 %v1604_v27, %v1556_v18  ;;  %v1475_v18 = vadd.f32 %v1474_v24, %v3831_v35 }
 0x24f   : > { %v1632_v32 = vmax.f32 %v1605_v20, 0.0 }
 0x252   : > { %v1557_v29 = vpop.f32.mrf.mxu2 }
 0x253   : > { %v1558_v30 = vadd.f32 %v1557_v29, %v1509_v26  ;;  %v1606_v31 = vpop.f32.mrf.mxu3  ;;  %v1523_v22 = vpop.f32.mrf.mxu1 }
 0x254   : > { %v1524_v29 = vadd.f32 %v1523_v22, %v1475_v18 }
 0x255   : > { %v1607_v36 = vadd.f32 %v1606_v31, %v1558_v30 }
 0x257   : > { %v1633_v39 = vmax.f32 %v1607_v36, 0.0 }
 0x259   : > { %v1644_v46 = vpack.c.bf16 %v1633_v39, %v1632_v32 }
 0x25a   : > { %v1560_v37 = vpop.f32.mrf.mxu2 }
 0x25b   : > { %v1609_v38 = vpop.f32.mrf.mxu3  ;;  %1741 = vmatmul.bf16.gmra.mxu0 %v1644_v46  ;;  %v1561_v9 = vadd.f32 %v1560_v37, %v1512_v2  ;;  %v2826_v46 = vld [vmem:[%s4072_s4 + $0x1] ss:$0 sm:$0xff] }
 0x25d   : > { %v1610_v55 = vadd.f32 %v1609_v38, %v1561_v9 }
 0x25f   : > { %v1634_v53 = vmax.f32 %v1610_v55, 0.0 }
 0x262   : > { %v1562_v42 = vpop.f32.mrf.mxu2 }
 0x263   : > { %v1563_v43 = vadd.f32 %v1562_v42, %v1514_v12  ;;  %v1611_v45 = vpop.f32.mrf.mxu3 }
 0x265   : > { %v1612_v47 = vadd.f32 %v1611_v45, %v1563_v43 }
 0x267   : > { %v1635_v60 = vmax.f32 %v1612_v47, 0.0 }
 0x269   : > { %v1645_v51 = vpack.c.bf16 %v1635_v60, %v1634_v53 }
 0x26a   : > { %v1565_v56 = vpop.f32.mrf.mxu2 }
 0x26b   : > { %v1614_v58 = vpop.f32.mrf.mxu3  ;;  %1746 = vmatmul.bf16.gmra.mxu0 %v1645_v51  ;;  %v1566_v21 = vadd.f32 %v1565_v56, %v1517_v1 }
 0x26d   : > { %v1615_v7 = vadd.f32 %v1614_v58, %v1566_v21 }
 0x26f   : > { %v1636_v23 = vmax.f32 %v1615_v7, 0.0 }
 0x272   : > { %v1567_v3 = vpop.f32.mrf.mxu2 }
 0x273   : > { %v1568_v10 = vadd.f32 %v1567_v3, %v1519_v54  ;;  %v1616_v11 = vpop.f32.mrf.mxu3 }
 0x275   : > { %v1617_v13 = vadd.f32 %v1616_v11, %v1568_v10 }
 0x277   : > { %v1637_v15 = vmax.f32 %v1617_v13, 0.0 }
 0x279   : > { %v1646_v27 = vpack.c.bf16 %v1637_v15, %v1636_v23 }
 0x27a   : > { %v1570_v28 = vpop.f32.mrf.mxu2 }
 0x27b   : > { %v1619_v17 = vpop.f32.mrf.mxu3  ;;  %1751 = vmatmul.bf16.gmra.mxu0 %v1646_v27  ;;  %v1571_v26 = vadd.f32 %v1570_v28, %v1522_v19 }
 0x27d   : > { %v1620_v30 = vadd.f32 %v1619_v17, %v1571_v26 }
 0x27f   : > { %v1638_v39 = vmax.f32 %v1620_v30, 0.0  ;;  %v2827_v30 = vld [vmem:[%s4072_s4 + $0x2] ss:$0 sm:$0xff] }
 0x282   : > { %v1572_v20 = vpop.f32.mrf.mxu2 }
 0x283   : > { %v1573_v31 = vadd.f32 %v1572_v20, %v1524_v29  ;;  %v1621_v36 = vpop.f32.mrf.mxu3 }
 0x285   : > { %v1622_v32 = vadd.f32 %v1621_v36, %v1573_v31 }
 0x287   : > { %v1639_v44 = vmax.f32 %v1622_v32, 0.0 }
 0x289   : > { %v1647_v41 = vpack.c.bf16 %v1639_v44, %v1638_v39 }
 0x28b   : > { %1756 = vmatmul.bf16.gmra.mxu0 %v1647_v41 }
 0x298   : > { %v1722_v33 = vpop.f32.mrf.mxu0 }
 0x299   : > { %v1723_v49 = vadd.f32 %v2826_v46, %v1722_v33 }
 0x29b   : > { %v1762_v37 = vmax.f32 %v1723_v49, 0.0 }
 0x2a0   : > { %v1724_v34 = vpop.f32.mrf.mxu0 }
 0x2a1   : > { %v1725_v35 = vadd.f32 %v2826_v46, %v1724_v34 }
 0x2a3   : > { %v1763_v6 = vmax.f32 %v1725_v35, 0.0 }
 0x2a5   : > { %v1778_v38 = vpack.c.bf16 %v1763_v6, %v1762_v37 }
 0x2a7   : > { %1859 = vmatmul.bf16.vlgmr.msrb.gmra.mxu1 %v1778_v38 }
 0x2a8   : > { %v1727_v40 = vpop.f32.mrf.mxu0 }
 0x2a9   : > { %v1728_v2 = vadd.f32 %v2826_v46, %v1727_v40 }
 0x2ab   : > { %v1764_v12 = vmax.f32 %v1728_v2, 0.0 }
 0x2b0   : > { %v1729_v8 = vpop.f32.mrf.mxu0 }
 0x2b1   : > { %v1730_v9 = vadd.f32 %v2826_v46, %v1729_v8 }
 0x2b3   : > { %v1765_v14 = vmax.f32 %v1730_v9, 0.0 }
 0x2b5   : > { %v1779_v42 = vpack.c.bf16 %v1765_v14, %v1764_v12 }
 0x2b7   : > { %1864 = vmatmul.bf16.gmra.mxu1 %v1779_v42 }
 0x2b8   : > { %v1732_v55 = vpop.f32.mrf.mxu0 }
 0x2b9   : > { %v1733_v43 = vadd.f32 %v2826_v46, %v1732_v55 }
 0x2bb   : > { %v1766_v48 = vmax.f32 %v1733_v43, 0.0 }
 0x2c0   : > { %v1734_v45 = vpop.f32.mrf.mxu0 }
 0x2c1   : > { %v1735_v47 = vadd.f32 %v2826_v46, %v1734_v45 }
 0x2c3   : > { %v1767_v53 = vmax.f32 %v1735_v47, 0.0 }
 0x2c5   : > { %v1780_v60 = vpack.c.bf16 %v1767_v53, %v1766_v48 }
 0x2c7   : > { %1869 = vmatmul.bf16.gmra.mxu1 %v1780_v60 }
 0x2c8   : > { %v1737_v50 = vpop.f32.mrf.mxu0 }
 0x2c9   : > { %v1738_v51 = vadd.f32 %v2826_v46, %v1737_v50 }
 0x2cb   : > { %v1768_v56 = vmax.f32 %v1738_v51, 0.0 }
 0x2d0   : > { %v1739_v52 = vpop.f32.mrf.mxu0 }
 0x2d1   : > { %v1740_v59 = vadd.f32 %v2826_v46, %v1739_v52 }
 0x2d3   : > { %v1769_v57 = vmax.f32 %v1740_v59, 0.0 }
 0x2d5   : > { %v1781_v58 = vpack.c.bf16 %v1769_v57, %v1768_v56 }
 0x2d7   : > { %1874 = vmatmul.bf16.gmra.mxu1 %v1781_v58 }
 0x2d8   : > { %v1742_v63 = vpop.f32.mrf.mxu0 }
 0x2d9   : > { %v1743_v62 = vadd.f32 %v2826_v46, %v1742_v63 }
 0x2db   : > { %v1770_v1 = vmax.f32 %v1743_v62, 0.0 }
 0x2e0   : > { %v1744_v61 = vpop.f32.mrf.mxu0 }
 0x2e1   : > { %v1745_v0 = vadd.f32 %v2826_v46, %v1744_v61 }
 0x2e3   : > { %v1771_v4 = vmax.f32 %v1745_v0, 0.0 }
 0x2e5   : > { %v1782_v21 = vpack.c.bf16 %v1771_v4, %v1770_v1 }
 0x2e7   : > { %1879 = vmatmul.bf16.gmra.mxu1 %v1782_v21 }
 0x2e8   : > { %v1747_v5 = vpop.f32.mrf.mxu0 }
 0x2e9   : > { %v1748_v54 = vadd.f32 %v2826_v46, %v1747_v5 }
 0x2eb   : > { %v1772_v10 = vmax.f32 %v1748_v54, 0.0 }
 0x2f0   : > { %v1749_v3 = vpop.f32.mrf.mxu0 }
 0x2f1   : > { %v1750_v7 = vadd.f32 %v2826_v46, %v1749_v3 }
 0x2f3   : > { %v1773_v11 = vmax.f32 %v1750_v7, 0.0 }
 0x2f5   : > { %v1783_v13 = vpack.c.bf16 %v1773_v11, %v1772_v10 }
 0x2f7   : > { %1884 = vmatmul.bf16.gmra.mxu1 %v1783_v13 }
 0x2f8   : > { %v1752_v25 = vpop.f32.mrf.mxu0 }
 0x2f9   : > { %v1753_v23 = vadd.f32 %v2826_v46, %v1752_v25 }
 0x2fb   : > { %v1774_v27 = vmax.f32 %v1753_v23, 0.0 }
 0x300   : > { %v1754_v15 = vpop.f32.mrf.mxu0 }
 0x301   : > { %v1755_v16 = vadd.f32 %v2826_v46, %v1754_v15 }
 0x303   : > { %v1775_v24 = vmax.f32 %v1755_v16, 0.0 }
 0x305   : > { %v1784_v28 = vpack.c.bf16 %v1775_v24, %v1774_v27 }
 0x307   : > { %1889 = vmatmul.bf16.gmra.mxu1 %v1784_v28 }
 0x308   : > { %v1757_v17 = vpop.f32.mrf.mxu0 }
 0x309   : > { %v1758_v19 = vadd.f32 %v2826_v46, %v1757_v17 }
 0x30b   : > { %v1776_v22 = vmax.f32 %v1758_v19, 0.0 }
 0x310   : > { %v1759_v18 = vpop.f32.mrf.mxu0 }
 0x311   : > { %v1760_v26 = vadd.f32 %v2826_v46, %v1759_v18 }
 0x313   : > { %v1777_v29 = vmax.f32 %v1760_v26, 0.0 }
 0x315   : > { %v1785_v20 = vpack.c.bf16 %v1777_v29, %v1776_v22 }
 0x317   : > { %1894 = vmatmul.bf16.gmra.mxu1 %v1785_v20 }
 0x324   : > { %v1860_v31 = vpop.f32.mrf.mxu1 }
 0x325   : > { %v1861_v36 = vadd.f32 %v2827_v30, %v1860_v31 }
 0x327   : > { %1900 = vmax.xlane.f32.xlu0 %v1861_v36 }
 0x32c   : > { %v1862_v32 = vpop.f32.mrf.mxu1 }
 0x32d   : > { %v1863_v39 = vadd.f32 %v2827_v30, %v1862_v32 }
 0x32f   : > { %1902 = vmax.xlane.f32.xlu0 %v1863_v39 }
 0x334   : > { %v1865_v44 = vpop.f32.mrf.mxu1 }
 0x335   : > { %v1866_v41 = vadd.f32 %v2827_v30, %v1865_v44 }
 0x337   : > { %1904 = vmax.xlane.f32.xlu1 %v1866_v41 }
 0x33c   : > { %v1867_v33 = vpop.f32.mrf.mxu1 }
 0x33d   : > { %v1868_v49 = vadd.f32 %v2827_v30, %v1867_v33 }
 0x33f   : > { %1906 = vmax.xlane.f32.xlu1 %v1868_v49 }
 0x344   : > { %v1870_v46 = vpop.f32.mrf.mxu1 }
 0x345   : > { %v1871_v34 = vadd.f32 %v2827_v30, %v1870_v46 }
 0x347   : > { %1908 = vmax.xlane.f32.xlu2 %v1871_v34 }
 0x34c   : > { %v1872_v35 = vpop.f32.mrf.mxu1 }
 0x34d   : > { %v3903_v37 = vadd.f32 %v2827_v30, %v1872_v35 }
 0x34f   : > { %1910 = vmax.xlane.f32.xlu2 %v3903_v37 }
 0x354   : > { %v1875_v6 = vpop.f32.mrf.mxu1 }
 0x355   : > { %v3906_v38 = vadd.f32 %v2827_v30, %v1875_v6 }
 0x357   : > { %1912 = vmax.xlane.f32.xlu0 %v3906_v38 }
 0x35c   : > { %v1877_v40 = vpop.f32.mrf.mxu1 }
 0x35d   : > { %v3909_v2 = vadd.f32 %v2827_v30, %v1877_v40 }
 0x35f   : > { %1914 = vmax.xlane.f32.xlu1 %v3909_v2 }
 0x364   : > { %v1880_v8 = vpop.f32.mrf.mxu1 }
 0x365   : > { %v3912_v9 = vadd.f32 %v2827_v30, %v1880_v8 }
 0x367   : > { %1916 = vmax.xlane.f32.xlu2 %v3912_v9 }
 0x36c   : > { %v1882_v12 = vpop.f32.mrf.mxu1 }
 0x36d   : > { %v3915_v14 = vadd.f32 %v2827_v30, %v1882_v12 }
 0x36f   : > { %1918 = vmax.xlane.f32.xlu0 %v3915_v14 }
 0x374   : > { %v1885_v42 = vpop.f32.mrf.mxu1 }
 0x375   : > { %v3918_v55 = vadd.f32 %v2827_v30, %v1885_v42 }
 0x377   : > { %1920 = vmax.xlane.f32.xlu1 %v3918_v55 }
 0x37c   : > { %v1887_v43 = vpop.f32.mrf.mxu1 }
 0x37d   : > { %v3921_v45 = vadd.f32 %v2827_v30, %v1887_v43 }
 0x37f   : > { %1922 = vmax.xlane.f32.xlu2 %v3921_v45 }
 0x384   : > { %v1890_v47 = vpop.f32.mrf.mxu1 }
 0x385   : > { %v3924_v48 = vadd.f32 %v2827_v30, %v1890_v47 }
 0x387   : > { %1924 = vmax.xlane.f32.xlu0 %v3924_v48 }
 0x38c   : > { %v1892_v53 = vpop.f32.mrf.mxu1 }
 0x38d   : > { %v3927_v60 = vadd.f32 %v2827_v30, %v1892_v53 }
 0x38f   : > { %1926 = vmax.xlane.f32.xlu1 %v3927_v60 }
 0x394   : > { %v1895_v50 = vpop.f32.mrf.mxu1 }
 0x395   : > { %v3930_v51 = vadd.f32 %v2827_v30, %v1895_v50 }
 0x397   : > { %1928 = vmax.xlane.f32.xlu2 %v3930_v51 }
 0x39a   : > { %v1901_v52 = vpop.xlane.xlu0 %1900 }
 0x39b   : > { %v1932_v59 = vsub.f32 %v1861_v36, %v1901_v52 }
 0x39c   : > { %v1897_v56 = vpop.f32.mrf.mxu1 }
 0x39d   : > { %v1948_v57 = vmul.f32 1.442695, %v1932_v59  ;;  %v3933_v58 = vadd.f32 %v2827_v30, %v1897_v56 }
 0x39f   : > { %3020 = vpow2.f32 %v1948_v57  ;;  %1930 = vmax.xlane.f32.xlu0 %v3933_v58 }
 0x3a2   : > { %v1903_v63 = vpop.xlane.xlu0 %1902 }
 0x3a3   : > { %v1933_v62 = vsub.f32 %v1863_v39, %v1903_v63 }
 0x3a5   : > { %v3936_v61 = vpop.eup %3020  ;;  %v1950_v0 = vmul.f32 1.442695, %v1933_v62 }
 0x3a6   : > { %1980 = vadd.xlane.f32.xlu1 %v3936_v61 }
 0x3a7   : > { %3022 = vpow2.f32 %v1950_v0 }
 0x3aa   : > { %v1905_v1 = vpop.xlane.xlu1 %1904 }
 0x3ab   : > { %v1934_v4 = vsub.f32 %v1866_v41, %v1905_v1 }
 0x3ad   : > { %v3939_v21 = vpop.eup %3022  ;;  %v1952_v5 = vmul.f32 1.442695, %v1934_v4 }
 0x3ae   : > { %1982 = vadd.xlane.f32.xlu2 %v3939_v21 }
 0x3af   : > { %3024 = vpow2.f32 %v1952_v5 }
 0x3b2   : > { %v1907_v54 = vpop.xlane.xlu1 %1906 }
 0x3b3   : > { %v1935_v3 = vsub.f32 %v1868_v49, %v1907_v54 }
 0x3b5   : > { %v3942_v7 = vpop.eup %3024  ;;  %v1954_v10 = vmul.f32 1.442695, %v1935_v3 }
 0x3b6   : > { %1984 = vadd.xlane.f32.xlu0 %v3942_v7 }
 0x3b7   : > { %3026 = vpow2.f32 %v1954_v10 }
 0x3ba   : > { %v1909_v11 = vpop.xlane.xlu2 %1908 }
 0x3bb   : > { %v1936_v13 = vsub.f32 %v1871_v34, %v1909_v11 }
 0x3bd   : > { %v3945_v25 = vpop.eup %3026  ;;  %v1956_v23 = vmul.f32 1.442695, %v1936_v13 }
 0x3be   : > { %1986 = vadd.xlane.f32.xlu1 %v3945_v25 }
 0x3bf   : > { %3028 = vpow2.f32 %v1956_v23 }
 0x3c2   : > { %v1911_v15 = vpop.xlane.xlu2 %1910 }
 0x3c3   : > { %v1937_v16 = vsub.f32 %v3903_v37, %v1911_v15 }
 0x3c5   : > { %v3949_v27 = vpop.eup %3028  ;;  %v1958_v24 = vmul.f32 1.442695, %v1937_v16 }
 0x3c6   : > { %1988 = vadd.xlane.f32.xlu2 %v3949_v27 }
 0x3c7   : > { %3030 = vpow2.f32 %v1958_v24 }
 0x3ca   : > { %v1913_v28 = vpop.xlane.xlu0 %1912 }
 0x3cb   : > { %v1938_v17 = vsub.f32 %v3906_v38, %v1913_v28 }
 0x3cd   : > { %v3953_v19 = vpop.eup %3030  ;;  %v1960_v18 = vmul.f32 1.442695, %v1938_v17 }
 0x3ce   : > { %1990 = vadd.xlane.f32.xlu0 %v3953_v19 }
 0x3cf   : > { %3032 = vpow2.f32 %v1960_v18 }
 0x3d2   : > { %v1915_v26 = vpop.xlane.xlu1 %1914 }
 0x3d3   : > { %v1939_v22 = vsub.f32 %v3909_v2, %v1915_v26 }
 0x3d5   : > { %v3957_v29 = vpop.eup %3032  ;;  %v1962_v20 = vmul.f32 1.442695, %v1939_v22 }
 0x3d6   : > { %1992 = vadd.xlane.f32.xlu1 %v3957_v29 }
 0x3d7   : > { %3034 = vpow2.f32 %v1962_v20 }
 0x3da   : > { %v1917_v30 = vpop.xlane.xlu2 %1916 }
 0x3db   : > { %v1940_v31 = vsub.f32 %v3912_v9, %v1917_v30 }
 0x3dd   : > { %v3961_v36 = vpop.eup %3034  ;;  %v1964_v32 = vmul.f32 1.442695, %v1940_v31 }
 0x3de   : > { %1994 = vadd.xlane.f32.xlu2 %v3961_v36 }
 0x3df   : > { %3036 = vpow2.f32 %v1964_v32 }
 0x3e2   : > { %v1919_v39 = vpop.xlane.xlu0 %1918 }
 0x3e3   : > { %v1941_v44 = vsub.f32 %v3915_v14, %v1919_v39 }
 0x3e5   : > { %v3965_v41 = vpop.eup %3036  ;;  %v1966_v33 = vmul.f32 1.442695, %v1941_v44 }
 0x3e6   : > { %1996 = vadd.xlane.f32.xlu0 %v3965_v41 }
 0x3e7   : > { %3038 = vpow2.f32 %v1966_v33 }
 0x3ea   : > { %v1921_v49 = vpop.xlane.xlu1 %1920 }
 0x3eb   : > { %v1942_v46 = vsub.f32 %v3918_v55, %v1921_v49 }
 0x3ed   : > { %v3969_v34 = vpop.eup %3038  ;;  %v1968_v35 = vmul.f32 1.442695, %v1942_v46 }
 0x3ee   : > { %1998 = vadd.xlane.f32.xlu1 %v3969_v34 }
 0x3ef   : > { %3040 = vpow2.f32 %v1968_v35 }
 0x3f2   : > { %v1923_v37 = vpop.xlane.xlu2 %1922 }
 0x3f3   : > { %v1943_v6 = vsub.f32 %v3921_v45, %v1923_v37 }
 0x3f5   : > { %v3973_v38 = vpop.eup %3040  ;;  %v1970_v40 = vmul.f32 1.442695, %v1943_v6 }
 0x3f6   : > { %2000 = vadd.xlane.f32.xlu2 %v3973_v38 }
 0x3f7   : > { %3042 = vpow2.f32 %v1970_v40 }
 0x3fa   : > { %v1925_v2 = vpop.xlane.xlu0 %1924 }
 0x3fb   : > { %v1944_v8 = vsub.f32 %v3924_v48, %v1925_v2 }
 0x3fd   : > { %v3977_v9 = vpop.eup %3042  ;;  %v1972_v12 = vmul.f32 1.442695, %v1944_v8 }
 0x3fe   : > { %2002 = vadd.xlane.f32.xlu0 %v3977_v9 }
 0x3ff   : > { %3044 = vpow2.f32 %v1972_v12 }
 0x402   : > { %v1927_v14 = vpop.xlane.xlu1 %1926 }
 0x403   : > { %v1945_v42 = vsub.f32 %v3927_v60, %v1927_v14 }
 0x405   : > { %v3981_v55 = vpop.eup %3044  ;;  %v1974_v43 = vmul.f32 1.442695, %v1945_v42 }
 0x406   : > { %2004 = vadd.xlane.f32.xlu1 %v3981_v55 }
 0x407   : > { %3046 = vpow2.f32 %v1974_v43 }
 0x40a   : > { %v1929_v45 = vpop.xlane.xlu2 %1928 }
 0x40b   : > { %v1946_v47 = vsub.f32 %v3930_v51, %v1929_v45 }
 0x40d   : > { %v3985_v53 = vpop.eup %3046  ;;  %v1976_v48 = vmul.f32 1.442695, %v1946_v47 }
 0x40e   : > { %2006 = vadd.xlane.f32.xlu2 %v3985_v53 }
 0x40f   : > { %3048 = vpow2.f32 %v1976_v48 }
 0x412   : > { %v1931_v50 = vpop.xlane.xlu0 %1930 }
 0x413   : > { %v1947_v52 = vsub.f32 %v3933_v58, %v1931_v50 }
 0x415   : > { %v3989_v59 = vpop.eup %3048  ;;  %v1978_v60 = vmul.f32 1.442695, %v1947_v52 }
 0x416   : > { %2008 = vadd.xlane.f32.xlu0 %v3989_v59 }
 0x417   : > { %3050 = vpow2.f32 %v1978_v60 }
 0x419   : > { %v1981_v56 = vpop.xlane.xlu1 %1980 }
 0x41a   : > { %3052 = vrcp.f32 %v1981_v56  ;;  %v2023_v1 = vand.u32 2147483648, %v1981_v56  ;;  %v2021_v4 = vand.u32 2147483647, %v1981_v56  ;;  %vm2017_vm2 = vweird.f32 %v1981_v56 }
 0x41c   : > { %v2024_v3 = vor.u32 1.1754944e-38, %v2023_v1  ;;  %vm2022_vm4 = vcmp.eq.f32.partialorder %v2021_v4, 8.507059e+37 }
 0x41d   : > { %v3992_v57 = vpop.eup %3050 }
 0x41e   : > { %2010 = vadd.xlane.f32.xlu1 %v3992_v57 }
 0x420   : > { %v3053_v51 = vpop.eup %3052 }
 0x421   : > { %v2013_v63 = vmul.f32 %v3053_v51, %v1981_v56  ;;  %v1983_v62 = vpop.xlane.xlu2 %1982  ;;  %vm2018_vm1 = vweird.f32 %v3053_v51 }
 0x422   : > { %3054 = vrcp.f32 %v1983_v62  ;;  %vm2019_vm3 = vmor %vm2017_vm2, %vm2018_vm1  ;;  %v2038_v24 = vand.u32 2147483648, %v1983_v62  ;;  %v2036_v17 = vand.u32 2147483647, %v1983_v62  ;;  %vm2032_vm6 = vweird.f32 %v1983_v62 }
 0x423   : > { %v2014_v0 = vsub.f32 1.0, %v2013_v63 }
 0x424   : > { %v2039_v22 = vor.u32 1.1754944e-38, %v2038_v24  ;;  %vm2037_vm8 = vcmp.eq.f32.partialorder %v2036_v17, 8.507059e+37 }
 0x425   : > { %v2015_v58 = vmul.f32 %v3053_v51, %v2014_v0 }
 0x427   : > { %v2016_v5 = vadd.f32 %v3053_v51, %v2015_v58 }
 0x428   : > { %v3055_v54 = vpop.eup %3054 }
 0x429   : > { %v2020_v10 = vsel %vm2019_vm3, %v3053_v51, %v2016_v5  ;;  %v2028_v11 = vmul.f32 %v3055_v54, %v1983_v62  ;;  %v1985_v13 = vpop.xlane.xlu0 %1984  ;;  %vm2033_vm5 = vweird.f32 %v3055_v54 }
 0x42a   : > { %v2025_v23 = vsel %vm2022_vm4, %v2024_v3, %v2020_v10  ;;  %3056 = vrcp.f32 %v1985_v13  ;;  %vm2034_vm7 = vmor %vm2032_vm6, %vm2033_vm5  ;;  %v2053_v44 = vand.u32 2147483648, %v1985_v13  ;;  %v2051_v49 = vand.u32 2147483647, %v1985_v13 }
 0x42b   : > { %v2026_v15 = vmul.f32 %v3936_v61, %v2025_v23  ;;  %v2029_v16 = vsub.f32 1.0, %v2028_v11  ;;  %vm2047_vm10 = vweird.f32 %v1985_v13 }
 0x42c   : > { %v2054_v37 = vor.u32 1.1754944e-38, %v2053_v44  ;;  %vm2052_vm12 = vcmp.eq.f32.partialorder %v2051_v49, 8.507059e+37 }
 0x42d   : > { %2252 = vst [vmem:[%s3997_s10] sm:$0xff] %v2026_v15  ;;  %v2030_v28 = vmul.f32 %v3055_v54, %v2029_v16 }
 0x42f   : > { %v2031_v18 = vadd.f32 %v3055_v54, %v2030_v28 }
 0x430   : > { %v3057_v26 = vpop.eup %3056 }
 0x431   : > { %v2035_v20 = vsel %vm2034_vm7, %v3055_v54, %v2031_v18  ;;  %v2043_v30 = vmul.f32 %v3057_v26, %v1985_v13  ;;  %v1987_v31 = vpop.xlane.xlu1 %1986  ;;  %vm2048_vm9 = vweird.f32 %v3057_v26 }
 0x432   : > { %v2040_v61 = vsel %vm2037_vm8, %v2039_v22, %v2035_v20  ;;  %3058 = vrcp.f32 %v1987_v31  ;;  %vm2049_vm11 = vmor %vm2047_vm10, %vm2048_vm9  ;;  %v2068_v14 = vand.u32 2147483648, %v1987_v31  ;;  %v2066_v43 = vand.u32 2147483647, %v1987_v31 }
 0x433   : > { %v2041_v32 = vmul.f32 %v3939_v21, %v2040_v61  ;;  %v2044_v39 = vsub.f32 1.0, %v2043_v30  ;;  %vm2062_vm14 = vweird.f32 %v1987_v31 }
 0x434   : > { %v2069_v48 = vor.u32 1.1754944e-38, %v2068_v14  ;;  %vm2067_vm0 = vcmp.eq.f32.partialorder %v2066_v43, 8.507059e+37 }
 0x435   : > { %2253 = vst [vmem:[%s3997_s10 + $0x8] sm:$0xff] %v2041_v32  ;;  %v2045_v33 = vmul.f32 %v3057_v26, %v2044_v39 }
 0x437   : > { %v2046_v46 = vadd.f32 %v3057_v26, %v2045_v33 }
 0x438   : > { %v3059_v35 = vpop.eup %3058 }
 0x439   : > { %v2050_v6 = vsel %vm2049_vm11, %v3057_v26, %v2046_v46  ;;  %v2058_v40 = vmul.f32 %v3059_v35, %v1987_v31  ;;  %v1989_v2 = vpop.xlane.xlu2 %1988  ;;  %vm2063_vm13 = vweird.f32 %v3059_v35 }
 0x43a   : > { %v2055_v8 = vsel %vm2052_vm12, %v2054_v37, %v2050_v6  ;;  %3060 = vrcp.f32 %v1989_v2  ;;  %vm2064_vm15 = vmor %vm2062_vm14, %vm2063_vm13  ;;  %v2083_v63 = vand.u32 2147483648, %v1989_v2  ;;  %v2081_v0 = vand.u32 2147483647, %v1989_v2 }
 0x43b   : > { %v2056_v21 = vmul.f32 %v3942_v7, %v2055_v8  ;;  %v2059_v12 = vsub.f32 1.0, %v2058_v40  ;;  %vm2077_vm2 = vweird.f32 %v1989_v2 }
 0x43c   : > { %v2084_v4 = vor.u32 1.1754944e-38, %v2083_v63  ;;  %vm2082_vm4 = vcmp.eq.f32.partialorder %v2081_v0, 8.507059e+37 }
 0x43d   : > { %2254 = vst [vmem:[%s3997_s10 + $0x10] sm:$0xff] %v2056_v21  ;;  %v2060_v42 = vmul.f32 %v3059_v35, %v2059_v12 }
 0x43f   : > { %v2061_v45 = vadd.f32 %v3059_v35, %v2060_v42 }
 0x440   : > { %v3061_v47 = vpop.eup %3060 }
 0x441   : > { %v2065_v50 = vsel %vm2064_vm15, %v3059_v35, %v2061_v45  ;;  %v2073_v52 = vmul.f32 %v3061_v47, %v1989_v2  ;;  %v1991_v60 = vpop.xlane.xlu0 %1990  ;;  %vm2078_vm1 = vweird.f32 %v3061_v47 }
 0x442   : > { %v2070_v56 = vsel %vm2067_vm0, %v2069_v48, %v2065_v50  ;;  %3062 = vrcp.f32 %v1991_v60  ;;  %vm2079_vm3 = vmor %vm2077_vm2, %vm2078_vm1  ;;  %v2098_v13 = vand.u32 2147483648, %v1991_v60  ;;  %v2096_v15 = vand.u32 2147483647, %v1991_v60 }
 0x443   : > { %v2071_v7 = vmul.f32 %v3945_v25, %v2070_v56  ;;  %v2074_v51 = vsub.f32 1.0, %v2073_v52  ;;  %vm2092_vm6 = vweird.f32 %v1991_v60 }
 0x444   : > { %v2099_v28 = vor.u32 1.1754944e-38, %v2098_v13  ;;  %vm2097_vm8 = vcmp.eq.f32.partialorder %v2096_v15, 8.507059e+37 }
 0x445   : > { %2255 = vst [vmem:[%s3997_s10 + $0x18] sm:$0xff] %v2071_v7  ;;  %v2075_v62 = vmul.f32 %v3061_v47, %v2074_v51 }
 0x447   : > { %v2076_v1 = vadd.f32 %v3061_v47, %v2075_v62 }
 0x448   : > { %v3063_v58 = vpop.eup %3062 }
 0x449   : > { %v2080_v5 = vsel %vm2079_vm3, %v3061_v47, %v2076_v1  ;;  %v2088_v54 = vmul.f32 %v3063_v58, %v1991_v60  ;;  %v1993_v3 = vpop.xlane.xlu1 %1992  ;;  %vm2093_vm5 = vweird.f32 %v3063_v58 }
 0x44a   : > { %v2085_v10 = vsel %vm2082_vm4, %v2084_v4, %v2080_v5  ;;  %3064 = vrcp.f32 %v1993_v3  ;;  %vm2094_vm7 = vmor %vm2092_vm6, %vm2093_vm5  ;;  %v2113_v30 = vand.u32 2147483648, %v1993_v3  ;;  %v2111_v61 = vand.u32 2147483647, %v1993_v3 }
 0x44b   : > { %v2086_v25 = vmul.f32 %v3949_v27, %v2085_v10  ;;  %v2089_v11 = vsub.f32 1.0, %v2088_v54  ;;  %vm2107_vm10 = vweird.f32 %v1993_v3 }
 0x44c   : > { %v2114_v44 = vor.u32 1.1754944e-38, %v2113_v30  ;;  %vm2112_vm12 = vcmp.eq.f32.partialorder %v2111_v61, 8.507059e+37 }
 0x44d   : > { %2256 = vst [vmem:[%s3997_s10 + $0x20] sm:$0xff] %v2086_v25  ;;  %v2090_v23 = vmul.f32 %v3063_v58, %v2089_v11 }
 0x44f   : > { %v2091_v16 = vadd.f32 %v3063_v58, %v2090_v23 }
 0x450   : > { %v3065_v24 = vpop.eup %3064 }
 0x451   : > { %v2095_v17 = vsel %vm2094_vm7, %v3063_v58, %v2091_v16  ;;  %v2103_v18 = vmul.f32 %v3065_v24, %v1993_v3  ;;  %v1995_v26 = vpop.xlane.xlu2 %1994  ;;  %vm2108_vm9 = vweird.f32 %v3065_v24 }
 0x452   : > { %v2100_v22 = vsel %vm2097_vm8, %v2099_v28, %v2095_v17  ;;  %3066 = vrcp.f32 %v1995_v26  ;;  %vm2109_vm11 = vmor %vm2107_vm10, %vm2108_vm9  ;;  %v2128_v6 = vand.u32 2147483648, %v1995_v26  ;;  %v2126_v2 = vand.u32 2147483647, %v1995_v26 }
 0x453   : > { %v2101_v27 = vmul.f32 %v3953_v19, %v2100_v22  ;;  %v2104_v20 = vsub.f32 1.0, %v2103_v18  ;;  %vm2122_vm14 = vweird.f32 %v1995_v26 }
 0x454   : > { %v2129_v12 = vor.u32 1.1754944e-38, %v2128_v6  ;;  %vm2127_vm0 = vcmp.eq.f32.partialorder %v2126_v2, 8.507059e+37 }
 0x455   : > { %2257 = vst [vmem:[%s3997_s10 + $0x28] sm:$0xff] %v2101_v27  ;;  %v2105_v31 = vmul.f32 %v3065_v24, %v2104_v20 }
 0x457   : > { %v2106_v32 = vadd.f32 %v3065_v24, %v2105_v31 }
 0x458   : > { %v3067_v39 = vpop.eup %3066 }
 0x459   : > { %v2110_v33 = vsel %vm2109_vm11, %v3065_v24, %v2106_v32  ;;  %v2118_v49 = vmul.f32 %v3067_v39, %v1995_v26  ;;  %v1997_v46 = vpop.xlane.xlu0 %1996  ;;  %vm2123_vm13 = vweird.f32 %v3067_v39 }
 0x45a   : > { %v2115_v35 = vsel %vm2112_vm12, %v2114_v44, %v2110_v33  ;;  %3068 = vrcp.f32 %v1997_v46  ;;  %vm2124_vm15 = vmor %vm2122_vm14, %vm2123_vm13  ;;  %v2143_v48 = vand.u32 2147483648, %v1997_v46  ;;  %v2141_v52 = vand.u32 2147483647, %v1997_v46 }
 0x45b   : > { %v2116_v19 = vmul.f32 %v3957_v29, %v2115_v35  ;;  %v2119_v37 = vsub.f32 1.0, %v2118_v49  ;;  %vm2137_vm2 = vweird.f32 %v1997_v46 }
 0x45c   : > { %v2144_v7 = vor.u32 1.1754944e-38, %v2143_v48  ;;  %vm2142_vm4 = vcmp.eq.f32.partialorder %v2141_v52, 8.507059e+37 }
 0x45d   : > { %2258 = vst [vmem:[%s3997_s10 + $0x30] sm:$0xff] %v2116_v19  ;;  %v2120_v40 = vmul.f32 %v3067_v39, %v2119_v37 }
 0x45f   : > { %v2121_v8 = vadd.f32 %v3067_v39, %v2120_v40 }
 0x460   : > { %v3069_v21 = vpop.eup %3068 }
 0x461   : > { %v2125_v14 = vsel %vm2124_vm15, %v3067_v39, %v2121_v8  ;;  %v2133_v42 = vmul.f32 %v3069_v21, %v1997_v46  ;;  %v1999_v43 = vpop.xlane.xlu1 %1998  ;;  %vm2138_vm1 = vweird.f32 %v3069_v21 }
 0x462   : > { %v2130_v45 = vsel %vm2127_vm0, %v2129_v12, %v2125_v14  ;;  %3070 = vrcp.f32 %v1999_v43  ;;  %vm2139_vm3 = vmor %vm2137_vm2, %vm2138_vm1  ;;  %v2158_v58 = vand.u32 2147483648, %v1999_v43  ;;  %v2156_v5 = vand.u32 2147483647, %v1999_v43 }
 0x463   : > { %v2131_v29 = vmul.f32 %v3961_v36, %v2130_v45  ;;  %v2134_v47 = vsub.f32 1.0, %v2133_v42  ;;  %vm2152_vm6 = vweird.f32 %v1999_v43 }
 0x464   : > { %v2159_v10 = vor.u32 1.1754944e-38, %v2158_v58  ;;  %vm2157_vm8 = vcmp.eq.f32.partialorder %v2156_v5, 8.507059e+37 }
 0x465   : > { %2259 = vst [vmem:[%s3997_s10 + $0x38] sm:$0xff] %v2131_v29  ;;  %v2135_v50 = vmul.f32 %v3069_v21, %v2134_v47 }
 0x467   : > { %v2136_v60 = vadd.f32 %v3069_v21, %v2135_v50 }
 0x468   : > { %v3071_v56 = vpop.eup %3070 }
 0x469   : > { %v2140_v51 = vsel %vm2139_vm3, %v3069_v21, %v2136_v60  ;;  %v2148_v63 = vmul.f32 %v3071_v56, %v1999_v43  ;;  %v2001_v62 = vpop.xlane.xlu2 %2000  ;;  %vm2153_vm5 = vweird.f32 %v3071_v56 }
 0x46a   : > { %v2145_v0 = vsel %vm2142_vm4, %v2144_v7, %v2140_v51  ;;  %3072 = vrcp.f32 %v2001_v62  ;;  %vm2154_vm7 = vmor %vm2152_vm6, %vm2153_vm5  ;;  %v2173_v16 = vand.u32 2147483648, %v2001_v62  ;;  %v2171_v28 = vand.u32 2147483647, %v2001_v62 }
 0x46b   : > { %v2146_v36 = vmul.f32 %v3965_v41, %v2145_v0  ;;  %v2149_v1 = vsub.f32 1.0, %v2148_v63  ;;  %vm2167_vm10 = vweird.f32 %v2001_v62 }
 0x46c   : > { %v2174_v26 = vor.u32 1.1754944e-38, %v2173_v16  ;;  %vm2172_vm12 = vcmp.eq.f32.partialorder %v2171_v28, 8.507059e+37 }
 0x46d   : > { %2260 = vst [vmem:[%s3997_s10 + $0x40] sm:$0xff] %v2146_v36  ;;  %v2150_v4 = vmul.f32 %v3071_v56, %v2149_v1 }
 0x46f   : > { %v2151_v54 = vadd.f32 %v3071_v56, %v2150_v4 }
 0x470   : > { %v3073_v3 = vpop.eup %3072 }
 0x471   : > { %v2155_v25 = vsel %vm2154_vm7, %v3071_v56, %v2151_v54  ;;  %v2163_v11 = vmul.f32 %v3073_v3, %v2001_v62  ;;  %v2003_v13 = vpop.xlane.xlu0 %2002  ;;  %vm2168_vm9 = vweird.f32 %v3073_v3 }
 0x472   : > { %v2160_v23 = vsel %vm2157_vm8, %v2159_v10, %v2155_v25  ;;  %3074 = vrcp.f32 %v2003_v13  ;;  %vm2169_vm11 = vmor %vm2167_vm10, %vm2168_vm9  ;;  %v2188_v61 = vand.u32 2147483648, %v2003_v13  ;;  %v2186_v39 = vand.u32 2147483647, %v2003_v13 }
 0x473   : > { %v2161_v41 = vmul.f32 %v3969_v34, %v2160_v23  ;;  %v2164_v15 = vsub.f32 1.0, %v2163_v11  ;;  %vm2182_vm14 = vweird.f32 %v2003_v13 }
 0x474   : > { %v2189_v49 = vor.u32 1.1754944e-38, %v2188_v61  ;;  %vm2187_vm0 = vcmp.eq.f32.partialorder %v2186_v39, 8.507059e+37 }
 0x475   : > { %2261 = vst [vmem:[%s3997_s10 + $0x48] sm:$0xff] %v2161_v41  ;;  %v2165_v24 = vmul.f32 %v3073_v3, %v2164_v15 }
 0x477   : > { %v2166_v17 = vadd.f32 %v3073_v3, %v2165_v24 }
 0x478   : > { %v3075_v18 = vpop.eup %3074 }
 0x479   : > { %v2170_v22 = vsel %vm2169_vm11, %v3073_v3, %v2166_v17  ;;  %v2178_v27 = vmul.f32 %v3075_v18, %v2003_v13  ;;  %v2005_v20 = vpop.xlane.xlu1 %2004  ;;  %vm2183_vm13 = vweird.f32 %v3075_v18 }
 0x47a   : > { %v2175_v30 = vsel %vm2172_vm12, %v2174_v26, %v2170_v22  ;;  %3076 = vrcp.f32 %v2005_v20  ;;  %vm2184_vm15 = vmor %vm2182_vm14, %vm2183_vm13  ;;  %v2203_v40 = vand.u32 2147483648, %v2005_v20  ;;  %v2201_v8 = vand.u32 2147483647, %v2005_v20 }
 0x47b   : > { %v2176_v34 = vmul.f32 %v3973_v38, %v2175_v30  ;;  %v2179_v31 = vsub.f32 1.0, %v2178_v27  ;;  %vm2197_vm2 = vweird.f32 %v2005_v20 }
 0x47c   : > { %v2204_v14 = vor.u32 1.1754944e-38, %v2203_v40  ;;  %vm2202_vm4 = vcmp.eq.f32.partialorder %v2201_v8, 8.507059e+37 }
 0x47d   : > { %2262 = vst [vmem:[%s3997_s10 + $0x50] sm:$0xff] %v2176_v34  ;;  %v2180_v32 = vmul.f32 %v3075_v18, %v2179_v31 }
 0x47f   : > { %v2181_v44 = vadd.f32 %v3075_v18, %v2180_v32 }
 0x480   : > { %v3077_v33 = vpop.eup %3076 }
 0x481   : > { %v2185_v46 = vsel %vm2184_vm15, %v3075_v18, %v2181_v44  ;;  %v2193_v35 = vmul.f32 %v3077_v33, %v2005_v20  ;;  %v2007_v19 = vpop.xlane.xlu2 %2006  ;;  %vm2198_vm1 = vweird.f32 %v3077_v33 }
 0x482   : > { %v2190_v37 = vsel %vm2187_vm0, %v2189_v49, %v2185_v46  ;;  %3078 = vrcp.f32 %v2007_v19  ;;  %vm2199_vm3 = vmor %vm2197_vm2, %vm2198_vm1  ;;  %v2218_v48 = vand.u32 2147483648, %v2007_v19  ;;  %v2216_v52 = vand.u32 2147483647, %v2007_v19 }
 0x483   : > { %v2191_v38 = vmul.f32 %v3977_v9, %v2190_v37  ;;  %v2194_v6 = vsub.f32 1.0, %v2193_v35  ;;  %vm2212_vm6 = vweird.f32 %v2007_v19 }
 0x484   : > { %v2219_v7 = vor.u32 1.1754944e-38, %v2218_v48  ;;  %vm2217_vm8 = vcmp.eq.f32.partialorder %v2216_v52, 8.507059e+37 }
 0x485   : > { %2263 = vst [vmem:[%s3997_s10 + $0x58] sm:$0xff] %v2191_v38  ;;  %v2195_v2 = vmul.f32 %v3077_v33, %v2194_v6 }
 0x487   : > { %v2196_v21 = vadd.f32 %v3077_v33, %v2195_v2 }
 0x488   : > { %v3079_v12 = vpop.eup %3078 }
 0x489   : > { %v2200_v42 = vsel %vm2199_vm3, %v3077_v33, %v2196_v21  ;;  %v2208_v43 = vmul.f32 %v3079_v12, %v2007_v19  ;;  %v2009_v45 = vpop.xlane.xlu0 %2008  ;;  %vm2213_vm5 = vweird.f32 %v3079_v12 }
 0x48a   : > { %v2205_v29 = vsel %vm2202_vm4, %v2204_v14, %v2200_v42  ;;  %3080 = vrcp.f32 %v2009_v45  ;;  %vm2214_vm7 = vmor %vm2212_vm6, %vm2213_vm5  ;;  %v2233_v1 = vand.u32 2147483648, %v2009_v45  ;;  %v2231_v4 = vand.u32 2147483647, %v2009_v45 }
 0x48b   : > { %v2206_v9 = vmul.f32 %v3981_v55, %v2205_v29  ;;  %v2209_v47 = vsub.f32 1.0, %v2208_v43  ;;  %vm2227_vm10 = vweird.f32 %v2009_v45 }
 0x48c   : > { %v2234_v3 = vor.u32 1.1754944e-38, %v2233_v1  ;;  %vm2232_vm12 = vcmp.eq.f32.partialorder %v2231_v4, 8.507059e+37 }
 0x48d   : > { %2264 = vst [vmem:[%s3997_s10 + $0x60] sm:$0xff] %v2206_v9  ;;  %v2210_v50 = vmul.f32 %v3079_v12, %v2209_v47 }
 0x48f   : > { %v2211_v60 = vadd.f32 %v3079_v12, %v2210_v50 }
 0x490   : > { %v3081_v56 = vpop.eup %3080 }
 0x491   : > { %v2215_v51 = vsel %vm2214_vm7, %v3079_v12, %v2211_v60  ;;  %v2223_v63 = vmul.f32 %v3081_v56, %v2009_v45  ;;  %v2011_v62 = vpop.xlane.xlu1 %2010  ;;  %vm2228_vm9 = vweird.f32 %v3081_v56 }
 0x492   : > { %v2220_v0 = vsel %vm2217_vm8, %v2219_v7, %v2215_v51  ;;  %3082 = vrcp.f32 %v2011_v62  ;;  %vm2229_vm11 = vmor %vm2227_vm10, %vm2228_vm9  ;;  %v2248_v23 = vand.u32 2147483648, %v2011_v62  ;;  %v2246_v15 = vand.u32 2147483647, %v2011_v62 }
 0x493   : > { %v2221_v55 = vmul.f32 %v3985_v53, %v2220_v0  ;;  %v2224_v36 = vsub.f32 1.0, %v2223_v63  ;;  %vm2242_vm14 = vweird.f32 %v2011_v62 }
 0x494   : > { %vm2247_vm0 = vcmp.eq.f32.partialorder %v2246_v15, 8.507059e+37 }
 0x495   : > { %2265 = vst [vmem:[%s3997_s10 + $0x68] sm:$0xff] %v2221_v55  ;;  %v2225_v58 = vmul.f32 %v3081_v56, %v2224_v36 }
 0x497   : > { %v2226_v5 = vadd.f32 %v3081_v56, %v2225_v58 }
 0x498   : > { %v3083_v54 = vpop.eup %3082 }
 0x499   : > { %v2230_v10 = vsel %vm2229_vm11, %v3081_v56, %v2226_v5  ;;  %v2238_v25 = vmul.f32 %v3083_v54, %v2011_v62  ;;  %vm2243_vm13 = vweird.f32 %v3083_v54 }
 0x49a   : > { %v2235_v11 = vsel %vm2232_vm12, %v2234_v3, %v2230_v10  ;;  %vm2244_vm15 = vmor %vm2242_vm14, %vm2243_vm13 }
 0x49b   : > { %v2236_v53 = vmul.f32 %v3989_v59, %v2235_v11  ;;  %v2239_v13 = vsub.f32 1.0, %v2238_v25  ;;  %v2249_v59 = vor.u32 1.1754944e-38, %v2248_v23 }
 0x49d   : > { %2266 = vst [vmem:[%s3997_s10 + $0x70] sm:$0xff] %v2236_v53  ;;  %v2240_v41 = vmul.f32 %v3083_v54, %v2239_v13 }
 0x49f   : > { %v2241_v16 = vadd.f32 %v3083_v54, %v2240_v41 }
 0x4a1   : > { %v2245_v24 = vsel %vm2244_vm15, %v3083_v54, %v2241_v16 }
 0x4a2   : > { %v2250_v28 = vsel %vm2247_vm0, %v2249_v59, %v2245_v24 }
 0x4a3   : > { %v2251_v17 = vmul.f32 %v3992_v57, %v2250_v28 }
 0x4a5   : > { %2267 = vst [vmem:[%s3997_s10 + $0x78] sm:$0xff] %v2251_v17 }
 0x4a6   : > { %3111 = shalt.err (!%p3108_p5)
}
 0x4a7   : > { %s3148_s26 = smov 128   ;;  %s3149_s9 = smov 8  }
 0x4a8   : > { %2784 = dma.vmem_to_hbm [thread:$0]  (%p3218_p6), %s2282_s15, 2048, %s2284_s22, %s2269_s16, %s3148_s26, %s3148_s26, %s3149_s9  }
 0x4a9 PF: > { %s2298_s10 = sand.u32 1, %s3134_s18   ;;  %p2787_p7 = pnand %p2354_p9, %p3222_p8 }
 0x4aa   : > { %s2299_s11 = scalar_lea.sflag [#allocation4], %s2298_s10 }
 0x4ab   : > { %p2788_p10 = pneg %p2787_p7 }
 0x4ad   : > { %3129 = dma.done.wait (%p2788_p10), %s2299_s11, 2048  }
 0x4ae   : > { %3131 = vsyncadd (%p2788_p10), %s2299_s11, 4294965248  ;;  %p15_p11 = scmp.ge.s32.totalorder %s3203_s24, 4   ;;  %s4076_s18 = smov %s3138_s19 }
 0x4af   : > { %s4077_s19 = smov %s3142_s20  ;;  %s4078_s20 = smov %s3216_s27 }
 0x4b0   : > { %s4079_s21 = smov %s3203_s24  ;;  %17 = sbr.rel (!%p15_p11) target bundleno = 3 (0x3), region = 119 }
 0x4b5   :  { %2305 = vsyncpa [#allocation4], 1 }
 0x4b6   :  { %2307 = vsyncpa [#allocation4 + $0x1], 1 }

</bundles_post_ra>
